<compile_context>
chip_gen: v5e
topology: v5e:2x2
jax: 0.10.0
libtpu: 0.0.40
codegen_flags: <defaults>
</compile_context>

<pallas_src>
import jax
import jax.numpy as jnp
from jax.experimental import pallas as pl
from jax.experimental.pallas import tpu as pltpu

# (in_dims, out_dims) of every layer, matching PointNetClsZCU104.__init__.
LAYER_DIMS = [
    (3, 64), (64, 64), (64, 64), (64, 128), (128, 1024),   # feat conv blocks
    (1024, 512), (512, 256),                                # cls fc+bn blocks
    (256, 40),                                              # final fc (logits)
]
C_IN_PAD = 8       # xyz (3) padded to 8 lanes
NUM_CLASSES = 40
LOGITS_PAD = 128   # logits lane-padded 40 -> 128 for dense stores
BN_EPS = 1e-5


# ----------------------------------------------------------------------------
# Kernel 1: feature extractor (5 pointwise convs) + fused global max-pool.
# One grid step = a block of bb point clouds; emits pooled features (bb, 1024).
# ----------------------------------------------------------------------------
def feat_kernel(x_ref, w1_ref, b1_ref, w2_ref, b2_ref, w3_ref, b3_ref,
                w4_ref, b4_ref, w5_ref, b5_ref, pooled_ref):
    bb, n, _ = x_ref.shape
    rows = bb * n
    x = x_ref[...].reshape(rows, C_IN_PAD)          # (R, 8) f32

    # Layer 1 (3 -> 64): K is degenerate for the MXU, so use 3 VPU
    # broadcast-FMAs over the real xyz channels (f32 elementwise, v5e-safe).
    w1 = w1_ref[...]                                # (8, 64) f32, rows 3..7 zero
    h = (x[:, 0:1] * w1[0:1, :]
         + x[:, 1:2] * w1[1:2, :]
         + x[:, 2:3] * w1[2:3, :]
         + b1_ref[...])
    h = jnp.maximum(h, 0.0)

    # Layers 2-4: bf16 MXU matmuls, f32 accumulation / bias / ReLU.
    for w_ref, b_ref in ((w2_ref, b2_ref), (w3_ref, b3_ref), (w4_ref, b4_ref)):
        h = jnp.dot(h.astype(jnp.bfloat16), w_ref[...],
                    preferred_element_type=jnp.float32) + b_ref[...]
        h = jnp.maximum(h, 0.0)

    # Layer 5 (128 -> 1024) fused with the per-cloud global max-pool:
    # compute Cout chunks and immediately reduce-max over the points axis, so
    # the full (rows, 1024) f32 activation is never materialized.  The
    # bias-add + ReLU are hoisted past the max (exact: bias is per-channel and
    # ReLU is monotone), so they act on (bb, chunk) instead of (rows, chunk).
    h_bf16 = h.astype(jnp.bfloat16)                 # (R, 128)
    cout5 = w5_ref.shape[1]
    chunk = 256
    while chunk > 128 and rows * chunk * 4 > (8 << 20):   # bound f32 intermediate
        chunk //= 2
    for c0 in range(0, cout5, chunk):
        z = jnp.dot(h_bf16, w5_ref[:, c0:c0 + chunk],
                    preferred_element_type=jnp.float32)     # (R, chunk)
        zmax = jnp.max(z.reshape(bb, n, chunk), axis=1)     # (bb, chunk)
        pooled_ref[:, c0:c0 + chunk] = jnp.maximum(
            zmax + b5_ref[:, c0:c0 + chunk], 0.0).astype(pooled_ref.dtype)


# ----------------------------------------------------------------------------
# Kernel 2: classifier head, tiled over the (padded) batch axis.
# ----------------------------------------------------------------------------
def head_kernel(g_ref, w6_ref, b6_ref, w7_ref, b7_ref, w8_ref, b8_ref, out_ref):
    g = g_ref[...]                                  # (hb, 1024) bf16
    g = jnp.dot(g, w6_ref[...], preferred_element_type=jnp.float32) + b6_ref[...]
    g = jnp.maximum(g, 0.0)
    g = jnp.dot(g.astype(jnp.bfloat16), w7_ref[...],
                preferred_element_type=jnp.float32) + b7_ref[...]
    g = jnp.maximum(g, 0.0)
    out_ref[...] = jnp.dot(g.astype(jnp.bfloat16), w8_ref[...],
                           preferred_element_type=jnp.float32) + b8_ref[...]


def _const_spec(shape):
    """BlockSpec for a weight/bias that is identical on every grid step."""
    # TODO(synk): pipeline_mode=pl.Buffered(1) would drop the pointless second
    # buffer for these constant blocks; left off pending lowering support.
    nd = len(shape)
    return pl.BlockSpec(shape, lambda b, nd=nd: (0,) * nd)


def _feat_block(batch, num_points, rows_target=2048):
    """Point clouds per feature-kernel grid step.

    Invariant: the returned bb is either a multiple of 8 (so the (bb, 1024)
    pooled output block satisfies the (8,128) rule) or equals the padded batch
    (single grid step -> full-dim exception)."""
    n = max(num_points, 1)
    bb0 = max(1, rows_target // n)
    if bb0 >= batch:
        # One step would cover the whole batch.  If we can split it into >= 2
        # equal multiple-of-8 steps *without padding*, do so (keeps both v7x
        # TensorCores busy); otherwise keep one full-batch step (no waste on
        # the single-core v5e/v6e).
        if batch >= 16:
            for cand in range((batch // 2) // 8 * 8, 7, -8):
                if batch % cand == 0:
                    return cand
        return batch
    # Multiple steps: bb must be a multiple of 8.  Among multiples of 8 in
    # [bb0/2, bb0] pick the one with the least batch padding (ties -> larger).
    hi = max(8, (bb0 // 8) * 8)
    lo = max(8, (hi // 2) // 8 * 8)
    best_bb, best_pad = hi, -(-batch // hi) * hi
    for cand in range(hi, lo - 1, -8):
        padded = -(-batch // cand) * cand
        if padded < best_pad:
            best_bb, best_pad = cand, padded
    return best_bb


def pointnet_forward(x, folded_params):
    """x: (B, N, 3) float32 -> logits (B, 40) float32."""
    B, N, _ = x.shape
    feat_params = folded_params[:5]
    head_params = folded_params[5:]

    bb = _feat_block(B, N)
    b_pad = -(-B // bb) * bb

    # Head tiling over batch: a single step for small batches, ~256-row blocks
    # (a multiple of bb, so b_pad stays aligned for both kernels) otherwise.
    if b_pad <= 512:
        hb = b_pad
    else:
        hb = max(bb, (256 // bb) * bb) if bb <= 256 else bb
        b_pad = -(-b_pad // hb) * hb

    # pad xyz channels 3 -> C_IN_PAD and batch B -> b_pad (zeros)
    xp = jnp.zeros((b_pad, N, C_IN_PAD), jnp.float32).at[:B, :, :3].set(x)

    # --- feature extractor + fused max-pool ---
    in_specs = [pl.BlockSpec((bb, N, C_IN_PAD), lambda b: (b, 0, 0))]
    flat_params = []
    for w, bias in feat_params:
        in_specs.append(_const_spec(w.shape))
        in_specs.append(_const_spec(bias.shape))
        flat_params += [w, bias]

    pooled = pl.pallas_call(
        feat_kernel,
        grid=(b_pad // bb,),
        in_specs=in_specs,
        out_specs=pl.BlockSpec((bb, 1024), lambda b: (b, 0)),
        out_shape=jax.ShapeDtypeStruct((b_pad, 1024), jnp.bfloat16),
        compiler_params=pltpu.CompilerParams(
            dimension_semantics=("parallel",),
            vmem_limit_bytes=32 << 20,
        ),
    )(xp, *flat_params)

    # --- classifier head: batch-tiled, pooled features consumed as bf16 ---
    head_specs = [pl.BlockSpec((hb, 1024), lambda i: (i, 0))]
    head_flat = []
    for w, bias in head_params:
        head_specs.append(_const_spec(w.shape))
        head_specs.append(_const_spec(bias.shape))
        head_flat += [w, bias]

    logits_pad = pl.pallas_call(
        head_kernel,
        grid=(b_pad // hb,),
        in_specs=head_specs,
        out_specs=pl.BlockSpec((hb, LOGITS_PAD), lambda i: (i, 0)),
        out_shape=jax.ShapeDtypeStruct((b_pad, LOGITS_PAD), jnp.float32),
        compiler_params=pltpu.CompilerParams(
            dimension_semantics=("parallel",),
            vmem_limit_bytes=32 << 20,
        ),
    )(pooled, *head_flat)

    return logits_pad[:B, :NUM_CLASSES]


def make_params(key):
    """Deterministic synthetic parameters; BN folded exactly like the ZCU104
    host code (scale = gamma / sqrt(running_var + eps)). MXU weights in bf16."""
    folded = []
    for li, (cin, cout) in enumerate(LAYER_DIMS):
        k = jax.random.fold_in(key, li)
        kw, kb, kg, kbe, km, kv = jax.random.split(k, 6)
        w = jax.random.normal(kw, (cin, cout), jnp.float32) * 0.1   # (Cin, Cout)
        cb = jax.random.normal(kb, (cout,), jnp.float32) * 0.1
        if li < 7:  # conv1..5, fc1, fc2 have a BatchNorm1d after them
            gamma = jax.random.uniform(kg, (cout,), jnp.float32, 0.5, 1.5)
            beta = jax.random.normal(kbe, (cout,), jnp.float32) * 0.1
            rmean = jax.random.normal(km, (cout,), jnp.float32) * 0.1
            rvar = jax.random.uniform(kv, (cout,), jnp.float32, 0.5, 1.5)
            scale = gamma / jnp.sqrt(rvar + BN_EPS)
            w_eff = w * scale[None, :]
            b_eff = scale * (cb - rmean) + beta
        else:       # fc3: plain linear
            w_eff, b_eff = w, cb

        if li == 0:
            # zero-pad input-channel rows 3 -> 8; stays f32 (VPU FMA path)
            w_pad = jnp.zeros((C_IN_PAD, cout), jnp.float32).at[:3, :].set(w_eff)
            folded.append((w_pad, b_eff.reshape(1, cout)))
        elif li == 7:
            # zero-pad logits lanes 40 -> 128; bf16 weight, f32 bias
            w_pad = jnp.zeros((cin, LOGITS_PAD), jnp.float32).at[:, :cout].set(w_eff)
            b_pad = jnp.zeros((1, LOGITS_PAD), jnp.float32).at[0, :cout].set(b_eff)
            folded.append((w_pad.astype(jnp.bfloat16), b_pad))
        else:
            folded.append((w_eff.astype(jnp.bfloat16), b_eff.reshape(1, cout)))
    return folded


def reference_forward(x, folded_params):
    """Pure-JAX reference using the same folded params / bf16 quantization."""
    B, N, _ = x.shape
    w1, b1 = folded_params[0]
    h = (x[..., 0:1] * w1[0, :] + x[..., 1:2] * w1[1, :]
         + x[..., 2:3] * w1[2, :] + b1)
    h = jnp.maximum(h, 0.0)
    for li in range(1, 5):
        w, b = folded_params[li]
        hh = jnp.dot(h.reshape(B * N, -1).astype(jnp.bfloat16), w,
                     preferred_element_type=jnp.float32)
        h = jnp.maximum(hh.reshape(B, N, -1) + b, 0.0)
    g = jnp.max(h, axis=1)                          # (B, 1024)
    for li in range(5, 7):
        w, b = folded_params[li]
        g = jnp.maximum(jnp.dot(g.astype(jnp.bfloat16), w,
                                preferred_element_type=jnp.float32) + b, 0.0)
    w8, b8 = folded_params[7]
    logits = jnp.dot(g.astype(jnp.bfloat16), w8,
                     preferred_element_type=jnp.float32) + b8
    return logits[:, :NUM_CLASSES]


if __name__ == "__main__":
    key = jax.random.PRNGKey(0)
    kx, kp = jax.random.split(key)

    batch, num_points = 2, 64
    x = jax.random.normal(kx, (batch, num_points, 3), jnp.float32)
    params = make_params(kp)

    logits = jax.block_until_ready(pointnet_forward(x, params))
    assert logits.shape == (batch, NUM_CLASSES) and logits.dtype == jnp.float32

    ref = jax.block_until_ready(reference_forward(x, params))
    assert jnp.allclose(logits, ref, rtol=1e-2, atol=1e-2), "mismatch vs reference"

    print("KERNEL_OK")
</pallas_src>

<mosaic_0001>
module attributes {stable_mosaic.version = 11 : i64} {
  func.func @feat_kernel(%arg0: i32, %arg1: memref<2x64x8xf32, #tpu.memory_space<vmem>>, %arg2: memref<8x64xf32, #tpu.memory_space<vmem>>, %arg3: memref<1x64xf32, #tpu.memory_space<vmem>>, %arg4: memref<64x64xbf16, #tpu.memory_space<vmem>>, %arg5: memref<1x64xf32, #tpu.memory_space<vmem>>, %arg6: memref<64x64xbf16, #tpu.memory_space<vmem>>, %arg7: memref<1x64xf32, #tpu.memory_space<vmem>>, %arg8: memref<64x128xbf16, #tpu.memory_space<vmem>>, %arg9: memref<1x128xf32, #tpu.memory_space<vmem>>, %arg10: memref<128x1024xbf16, #tpu.memory_space<vmem>>, %arg11: memref<1x1024xf32, #tpu.memory_space<vmem>>, %arg12: memref<2x1024xbf16, #tpu.memory_space<vmem>>) attributes {dimension_semantics = [#tpu.dimension_semantics<parallel>], iteration_bounds = array<i64: 1>, scalar_prefetch = 0 : i64, scratch_operands = 0 : i64, tpu.core_type = #tpu.core_type<tc>, window_params = [{transform_indices = @transform_0, window_bounds = array<i64: 2, 64, 8>}, {pipeline_mode = #tpu.pipeline_mode<synchronous>, transform_indices = @transform_1, window_bounds = array<i64: 8, 64>}, {pipeline_mode = #tpu.pipeline_mode<synchronous>, transform_indices = @transform_2, window_bounds = array<i64: 1, 64>}, {pipeline_mode = #tpu.pipeline_mode<synchronous>, transform_indices = @transform_3, window_bounds = array<i64: 64, 64>}, {pipeline_mode = #tpu.pipeline_mode<synchronous>, transform_indices = @transform_4, window_bounds = array<i64: 1, 64>}, {pipeline_mode = #tpu.pipeline_mode<synchronous>, transform_indices = @transform_5, window_bounds = array<i64: 64, 64>}, {pipeline_mode = #tpu.pipeline_mode<synchronous>, transform_indices = @transform_6, window_bounds = array<i64: 1, 64>}, {pipeline_mode = #tpu.pipeline_mode<synchronous>, transform_indices = @transform_7, window_bounds = array<i64: 64, 128>}, {pipeline_mode = #tpu.pipeline_mode<synchronous>, transform_indices = @transform_8, window_bounds = array<i64: 1, 128>}, {pipeline_mode = #tpu.pipeline_mode<synchronous>, transform_indices = @transform_9, window_bounds = array<i64: 128, 1024>}, {pipeline_mode = #tpu.pipeline_mode<synchronous>, transform_indices = @transform_10, window_bounds = array<i64: 1, 1024>}, {transform_indices = @transform_11, window_bounds = array<i64: 2, 1024>}]} {
    %c0 = arith.constant 0 : index
    %c0_0 = arith.constant 0 : index
    %c0_1 = arith.constant 0 : index
    %0 = vector.load %arg1[%c0, %c0_0, %c0_1] : memref<2x64x8xf32, #tpu.memory_space<vmem>>, vector<2x64x8xf32>
    %1 = vector.shape_cast %0 : vector<2x64x8xf32> to vector<128x8xf32>
    %c0_2 = arith.constant 0 : index
    %c0_3 = arith.constant 0 : index
    %2 = vector.load %arg2[%c0_2, %c0_3] : memref<8x64xf32, #tpu.memory_space<vmem>>, vector<8x64xf32>
    %3 = vector.extract_strided_slice %1 {offsets = [0, 0], sizes = [128, 1], strides = [1, 1]} : vector<128x8xf32> to vector<128x1xf32>
    %4 = vector.extract_strided_slice %2 {offsets = [0, 0], sizes = [1, 64], strides = [1, 1]} : vector<8x64xf32> to vector<1x64xf32>
    %5 = vector.broadcast %3 : vector<128x1xf32> to vector<128x64xf32>
    %6 = vector.broadcast %4 : vector<1x64xf32> to vector<128x64xf32>
    %7 = arith.mulf %5, %6 : vector<128x64xf32>
    %8 = vector.extract_strided_slice %1 {offsets = [0, 1], sizes = [128, 1], strides = [1, 1]} : vector<128x8xf32> to vector<128x1xf32>
    %9 = vector.extract_strided_slice %2 {offsets = [1, 0], sizes = [1, 64], strides = [1, 1]} : vector<8x64xf32> to vector<1x64xf32>
    %10 = vector.broadcast %8 : vector<128x1xf32> to vector<128x64xf32>
    %11 = vector.broadcast %9 : vector<1x64xf32> to vector<128x64xf32>
    %12 = arith.mulf %10, %11 : vector<128x64xf32>
    %13 = arith.addf %7, %12 : vector<128x64xf32>
    %14 = vector.extract_strided_slice %1 {offsets = [0, 2], sizes = [128, 1], strides = [1, 1]} : vector<128x8xf32> to vector<128x1xf32>
    %15 = vector.extract_strided_slice %2 {offsets = [2, 0], sizes = [1, 64], strides = [1, 1]} : vector<8x64xf32> to vector<1x64xf32>
    %16 = vector.broadcast %14 : vector<128x1xf32> to vector<128x64xf32>
    %17 = vector.broadcast %15 : vector<1x64xf32> to vector<128x64xf32>
    %18 = arith.mulf %16, %17 : vector<128x64xf32>
    %19 = arith.addf %13, %18 : vector<128x64xf32>
    %c0_4 = arith.constant 0 : index
    %c0_5 = arith.constant 0 : index
    %20 = vector.load %arg3[%c0_4, %c0_5] : memref<1x64xf32, #tpu.memory_space<vmem>>, vector<1x64xf32>
    %21 = vector.broadcast %20 : vector<1x64xf32> to vector<128x64xf32>
    %22 = arith.addf %19, %21 : vector<128x64xf32>
    %cst = arith.constant 0.000000e+00 : f32
    %23 = vector.broadcast %cst : f32 to vector<128x64xf32>
    %24 = arith.maximumf %22, %23 : vector<128x64xf32>
    %25 = arith.truncf %24 : vector<128x64xf32> to vector<128x64xbf16>
    %c0_6 = arith.constant 0 : index
    %c0_7 = arith.constant 0 : index
    %26 = vector.load %arg4[%c0_6, %c0_7] : memref<64x64xbf16, #tpu.memory_space<vmem>>, vector<64x64xbf16>
    %cst_8 = arith.constant dense<0.000000e+00> : vector<128x64xf32>
    %27 = tpu.matmul %25, %26, %cst_8 {dimension_numbers = #tpu.dot_dimension_numbers<[1], [0], [0], [1], [0, 0, 1, 1], [], []>} : vector<128x64xbf16>, vector<64x64xbf16>, vector<128x64xf32> -> vector<128x64xf32>
    %c0_9 = arith.constant 0 : index
    %c0_10 = arith.constant 0 : index
    %28 = vector.load %arg5[%c0_9, %c0_10] : memref<1x64xf32, #tpu.memory_space<vmem>>, vector<1x64xf32>
    %29 = vector.broadcast %28 : vector<1x64xf32> to vector<128x64xf32>
    %30 = arith.addf %27, %29 : vector<128x64xf32>
    %cst_11 = arith.constant 0.000000e+00 : f32
    %31 = vector.broadcast %cst_11 : f32 to vector<128x64xf32>
    %32 = arith.maximumf %30, %31 : vector<128x64xf32>
    %33 = arith.truncf %32 : vector<128x64xf32> to vector<128x64xbf16>
    %c0_12 = arith.constant 0 : index
    %c0_13 = arith.constant 0 : index
    %34 = vector.load %arg6[%c0_12, %c0_13] : memref<64x64xbf16, #tpu.memory_space<vmem>>, vector<64x64xbf16>
    %cst_14 = arith.constant dense<0.000000e+00> : vector<128x64xf32>
    %35 = tpu.matmul %33, %34, %cst_14 {dimension_numbers = #tpu.dot_dimension_numbers<[1], [0], [0], [1], [0, 0, 1, 1], [], []>} : vector<128x64xbf16>, vector<64x64xbf16>, vector<128x64xf32> -> vector<128x64xf32>
    %c0_15 = arith.constant 0 : index
    %c0_16 = arith.constant 0 : index
    %36 = vector.load %arg7[%c0_15, %c0_16] : memref<1x64xf32, #tpu.memory_space<vmem>>, vector<1x64xf32>
    %37 = vector.broadcast %36 : vector<1x64xf32> to vector<128x64xf32>
    %38 = arith.addf %35, %37 : vector<128x64xf32>
    %cst_17 = arith.constant 0.000000e+00 : f32
    %39 = vector.broadcast %cst_17 : f32 to vector<128x64xf32>
    %40 = arith.maximumf %38, %39 : vector<128x64xf32>
    %41 = arith.truncf %40 : vector<128x64xf32> to vector<128x64xbf16>
    %c0_18 = arith.constant 0 : index
    %c0_19 = arith.constant 0 : index
    %42 = vector.load %arg8[%c0_18, %c0_19] : memref<64x128xbf16, #tpu.memory_space<vmem>>, vector<64x128xbf16>
    %cst_20 = arith.constant dense<0.000000e+00> : vector<128x128xf32>
    %43 = tpu.matmul %41, %42, %cst_20 {dimension_numbers = #tpu.dot_dimension_numbers<[1], [0], [0], [1], [0, 0, 1, 1], [], []>} : vector<128x64xbf16>, vector<64x128xbf16>, vector<128x128xf32> -> vector<128x128xf32>
    %c0_21 = arith.constant 0 : index
    %c0_22 = arith.constant 0 : index
    %44 = vector.load %arg9[%c0_21, %c0_22] : memref<1x128xf32, #tpu.memory_space<vmem>>, vector<1x128xf32>
    %45 = vector.broadcast %44 : vector<1x128xf32> to vector<128x128xf32>
    %46 = arith.addf %43, %45 : vector<128x128xf32>
    %cst_23 = arith.constant 0.000000e+00 : f32
    %47 = vector.broadcast %cst_23 : f32 to vector<128x128xf32>
    %48 = arith.maximumf %46, %47 : vector<128x128xf32>
    %49 = arith.truncf %48 : vector<128x128xf32> to vector<128x128xbf16>
    %c0_24 = arith.constant 0 : index
    %c0_25 = arith.constant 0 : index
    %50 = vector.load %arg10[%c0_24, %c0_25] : memref<128x1024xbf16, #tpu.memory_space<vmem>>, vector<128x256xbf16>
    %cst_26 = arith.constant dense<0.000000e+00> : vector<128x256xf32>
    %51 = tpu.matmul %49, %50, %cst_26 {dimension_numbers = #tpu.dot_dimension_numbers<[1], [0], [0], [1], [0, 0, 1, 1], [], []>} : vector<128x128xbf16>, vector<128x256xbf16>, vector<128x256xf32> -> vector<128x256xf32>
    %52 = vector.shape_cast %51 : vector<128x256xf32> to vector<2x64x256xf32>
    %cst_27 = arith.constant dense<0xFF800000> : vector<2x256xf32>
    %53 = vector.multi_reduction <maximumf>, %52, %cst_27 [1] : vector<2x64x256xf32> to vector<2x256xf32>
    %c0_28 = arith.constant 0 : index
    %c0_29 = arith.constant 0 : index
    %54 = vector.load %arg11[%c0_28, %c0_29] : memref<1x1024xf32, #tpu.memory_space<vmem>>, vector<1x256xf32>
    %55 = vector.broadcast %54 : vector<1x256xf32> to vector<2x256xf32>
    %56 = arith.addf %53, %55 : vector<2x256xf32>
    %cst_30 = arith.constant 0.000000e+00 : f32
    %57 = vector.broadcast %cst_30 : f32 to vector<2x256xf32>
    %58 = arith.maximumf %56, %57 : vector<2x256xf32>
    %59 = arith.truncf %58 : vector<2x256xf32> to vector<2x256xbf16>
    %c0_31 = arith.constant 0 : index
    %c0_32 = arith.constant 0 : index
    %60 = vector.load %arg12[%c0_31, %c0_32] : memref<2x1024xbf16, #tpu.memory_space<vmem>>, vector<2x256xbf16>
    tpu.vector_store %arg12[%c0_31, %c0_32], %59 {strides = array<i32>} : memref<2x1024xbf16, #tpu.memory_space<vmem>>, vector<2x256xbf16>,
    %c0_33 = arith.constant 0 : index
    %c256 = arith.constant 256 : index
    %61 = vector.load %arg10[%c0_33, %c256] : memref<128x1024xbf16, #tpu.memory_space<vmem>>, vector<128x256xbf16>
    %cst_34 = arith.constant dense<0.000000e+00> : vector<128x256xf32>
    %62 = tpu.matmul %49, %61, %cst_34 {dimension_numbers = #tpu.dot_dimension_numbers<[1], [0], [0], [1], [0, 0, 1, 1], [], []>} : vector<128x128xbf16>, vector<128x256xbf16>, vector<128x256xf32> -> vector<128x256xf32>
    %63 = vector.shape_cast %62 : vector<128x256xf32> to vector<2x64x256xf32>
    %cst_35 = arith.constant dense<0xFF800000> : vector<2x256xf32>
    %64 = vector.multi_reduction <maximumf>, %63, %cst_35 [1] : vector<2x64x256xf32> to vector<2x256xf32>
    %c0_36 = arith.constant 0 : index
    %c256_37 = arith.constant 256 : index
    %65 = vector.load %arg11[%c0_36, %c256_37] : memref<1x1024xf32, #tpu.memory_space<vmem>>, vector<1x256xf32>
    %66 = vector.broadcast %65 : vector<1x256xf32> to vector<2x256xf32>
    %67 = arith.addf %64, %66 : vector<2x256xf32>
    %cst_38 = arith.constant 0.000000e+00 : f32
    %68 = vector.broadcast %cst_38 : f32 to vector<2x256xf32>
    %69 = arith.maximumf %67, %68 : vector<2x256xf32>
    %70 = arith.truncf %69 : vector<2x256xf32> to vector<2x256xbf16>
    %c0_39 = arith.constant 0 : index
    %c256_40 = arith.constant 256 : index
    %71 = vector.load %arg12[%c0_39, %c256_40] : memref<2x1024xbf16, #tpu.memory_space<vmem>>, vector<2x256xbf16>
    tpu.vector_store %arg12[%c0_39, %c256_40], %70 {strides = array<i32>} : memref<2x1024xbf16, #tpu.memory_space<vmem>>, vector<2x256xbf16>,
    %c0_41 = arith.constant 0 : index
    %c512 = arith.constant 512 : index
    %72 = vector.load %arg10[%c0_41, %c512] : memref<128x1024xbf16, #tpu.memory_space<vmem>>, vector<128x256xbf16>
    %cst_42 = arith.constant dense<0.000000e+00> : vector<128x256xf32>
    %73 = tpu.matmul %49, %72, %cst_42 {dimension_numbers = #tpu.dot_dimension_numbers<[1], [0], [0], [1], [0, 0, 1, 1], [], []>} : vector<128x128xbf16>, vector<128x256xbf16>, vector<128x256xf32> -> vector<128x256xf32>
    %74 = vector.shape_cast %73 : vector<128x256xf32> to vector<2x64x256xf32>
    %cst_43 = arith.constant dense<0xFF800000> : vector<2x256xf32>
    %75 = vector.multi_reduction <maximumf>, %74, %cst_43 [1] : vector<2x64x256xf32> to vector<2x256xf32>
    %c0_44 = arith.constant 0 : index
    %c512_45 = arith.constant 512 : index
    %76 = vector.load %arg11[%c0_44, %c512_45] : memref<1x1024xf32, #tpu.memory_space<vmem>>, vector<1x256xf32>
    %77 = vector.broadcast %76 : vector<1x256xf32> to vector<2x256xf32>
    %78 = arith.addf %75, %77 : vector<2x256xf32>
    %cst_46 = arith.constant 0.000000e+00 : f32
    %79 = vector.broadcast %cst_46 : f32 to vector<2x256xf32>
    %80 = arith.maximumf %78, %79 : vector<2x256xf32>
    %81 = arith.truncf %80 : vector<2x256xf32> to vector<2x256xbf16>
    %c0_47 = arith.constant 0 : index
    %c512_48 = arith.constant 512 : index
    %82 = vector.load %arg12[%c0_47, %c512_48] : memref<2x1024xbf16, #tpu.memory_space<vmem>>, vector<2x256xbf16>
    tpu.vector_store %arg12[%c0_47, %c512_48], %81 {strides = array<i32>} : memref<2x1024xbf16, #tpu.memory_space<vmem>>, vector<2x256xbf16>,
    %c0_49 = arith.constant 0 : index
    %c768 = arith.constant 768 : index
    %83 = vector.load %arg10[%c0_49, %c768] : memref<128x1024xbf16, #tpu.memory_space<vmem>>, vector<128x256xbf16>
    %cst_50 = arith.constant dense<0.000000e+00> : vector<128x256xf32>
    %84 = tpu.matmul %49, %83, %cst_50 {dimension_numbers = #tpu.dot_dimension_numbers<[1], [0], [0], [1], [0, 0, 1, 1], [], []>} : vector<128x128xbf16>, vector<128x256xbf16>, vector<128x256xf32> -> vector<128x256xf32>
    %85 = vector.shape_cast %84 : vector<128x256xf32> to vector<2x64x256xf32>
    %cst_51 = arith.constant dense<0xFF800000> : vector<2x256xf32>
    %86 = vector.multi_reduction <maximumf>, %85, %cst_51 [1] : vector<2x64x256xf32> to vector<2x256xf32>
    %c0_52 = arith.constant 0 : index
    %c768_53 = arith.constant 768 : index
    %87 = vector.load %arg11[%c0_52, %c768_53] : memref<1x1024xf32, #tpu.memory_space<vmem>>, vector<1x256xf32>
    %88 = vector.broadcast %87 : vector<1x256xf32> to vector<2x256xf32>
    %89 = arith.addf %86, %88 : vector<2x256xf32>
    %cst_54 = arith.constant 0.000000e+00 : f32
    %90 = vector.broadcast %cst_54 : f32 to vector<2x256xf32>
    %91 = arith.maximumf %89, %90 : vector<2x256xf32>
    %92 = arith.truncf %91 : vector<2x256xf32> to vector<2x256xbf16>
    %c0_55 = arith.constant 0 : index
    %c768_56 = arith.constant 768 : index
    %93 = vector.load %arg12[%c0_55, %c768_56] : memref<2x1024xbf16, #tpu.memory_space<vmem>>, vector<2x256xbf16>
    tpu.vector_store %arg12[%c0_55, %c768_56], %92 {strides = array<i32>} : memref<2x1024xbf16, #tpu.memory_space<vmem>>, vector<2x256xbf16>,
    return
  }
  func.func @transform_0(%arg0: i32) -> (i32, i32, i32) {
    %c0_i32 = arith.constant 0 : i32
    %c0_i32_0 = arith.constant 0 : i32
    %c0_i32_1 = arith.constant 0 : i32
    return %arg0, %c0_i32, %c0_i32_0 : i32, i32, i32
  }
  func.func @transform_1(%arg0: i32) -> (i32, i32) {
    %c0_i32 = arith.constant 0 : i32
    %c0_i32_0 = arith.constant 0 : i32
    %c0_i32_1 = arith.constant 0 : i32
    return %c0_i32, %c0_i32_0 : i32, i32
  }
  func.func @transform_2(%arg0: i32) -> (i32, i32) {
    %c0_i32 = arith.constant 0 : i32
    %c0_i32_0 = arith.constant 0 : i32
    %c0_i32_1 = arith.constant 0 : i32
    return %c0_i32, %c0_i32_0 : i32, i32
  }
  func.func @transform_3(%arg0: i32) -> (i32, i32) {
    %c0_i32 = arith.constant 0 : i32
    %c0_i32_0 = arith.constant 0 : i32
    %c0_i32_1 = arith.constant 0 : i32
    return %c0_i32, %c0_i32_0 : i32, i32
  }
  func.func @transform_4(%arg0: i32) -> (i32, i32) {
    %c0_i32 = arith.constant 0 : i32
    %c0_i32_0 = arith.constant 0 : i32
    %c0_i32_1 = arith.constant 0 : i32
    return %c0_i32, %c0_i32_0 : i32, i32
  }
  func.func @transform_5(%arg0: i32) -> (i32, i32) {
    %c0_i32 = arith.constant 0 : i32
    %c0_i32_0 = arith.constant 0 : i32
    %c0_i32_1 = arith.constant 0 : i32
    return %c0_i32, %c0_i32_0 : i32, i32
  }
  func.func @transform_6(%arg0: i32) -> (i32, i32) {
    %c0_i32 = arith.constant 0 : i32
    %c0_i32_0 = arith.constant 0 : i32
    %c0_i32_1 = arith.constant 0 : i32
    return %c0_i32, %c0_i32_0 : i32, i32
  }
  func.func @transform_7(%arg0: i32) -> (i32, i32) {
    %c0_i32 = arith.constant 0 : i32
    %c0_i32_0 = arith.constant 0 : i32
    %c0_i32_1 = arith.constant 0 : i32
    return %c0_i32, %c0_i32_0 : i32, i32
  }
  func.func @transform_8(%arg0: i32) -> (i32, i32) {
    %c0_i32 = arith.constant 0 : i32
    %c0_i32_0 = arith.constant 0 : i32
    %c0_i32_1 = arith.constant 0 : i32
    return %c0_i32, %c0_i32_0 : i32, i32
  }
  func.func @transform_9(%arg0: i32) -> (i32, i32) {
    %c0_i32 = arith.constant 0 : i32
    %c0_i32_0 = arith.constant 0 : i32
    %c0_i32_1 = arith.constant 0 : i32
    return %c0_i32, %c0_i32_0 : i32, i32
  }
  func.func @transform_10(%arg0: i32) -> (i32, i32) {
    %c0_i32 = arith.constant 0 : i32
    %c0_i32_0 = arith.constant 0 : i32
    %c0_i32_1 = arith.constant 0 : i32
    return %c0_i32, %c0_i32_0 : i32, i32
  }
  func.func @transform_11(%arg0: i32) -> (i32, i32) {
    %c0_i32 = arith.constant 0 : i32
    %c0_i32_0 = arith.constant 0 : i32
    return %arg0, %c0_i32 : i32, i32
  }
}

</mosaic_0001>

<bundles_post_ra>
// kernel: tpu_custom_call.1
= control target key start
LH: loop header
LB: loop body
LE: loop exit
PB: predicated region body
PF: predicated region fallthrough
CT: control target
= control target key end

     0   :  { %16 = vsyncpa [#allocation3], 0  ;;  %s3091_s0 = inlined_call_operand.vmem [shape: f32[2,64,8], index: 0, kind: input, shape index: {}]   ;;  %s3092_s1 = inlined_call_operand.vmem [shape: f32[8,64], index: 1, kind: input, shape index: {}]   ;;  %s3093_s2 = inlined_call_operand.vmem [shape: f32[1,64], index: 2, kind: input, shape index: {}]   ;;  %s3094_s3 = inlined_call_operand.vmem [shape: bf16[64,64], index: 3, kind: input, shape index: {}]   ;;  %s3095_s4 = inlined_call_operand.vmem [shape: f32[1,64], index: 4, kind: input, shape index: {}]   ;;  %s3096_s5 = inlined_call_operand.vmem [shape: bf16[64,64], index: 5, kind: input, shape index: {}]   ;;  %s3097_s6 = inlined_call_operand.vmem [shape: f32[1,64], index: 6, kind: input, shape index: {}]   ;;  %s3098_s7 = inlined_call_operand.vmem [shape: bf16[64,128], index: 7, kind: input, shape index: {}]   ;;  %s3099_s8 = inlined_call_operand.vmem [shape: f32[1,128], index: 8, kind: input, shape index: {}]   ;;  %s3100_s9 = inlined_call_operand.hbm [shape: bf16[128,1024], index: 9, kind: input, shape index: {}]   ;;  %s3101_s10 = inlined_call_operand.vmem [shape: f32[1,1024], index: 10, kind: input, shape index: {}]   ;;  %s3102_s11 = inlined_call_operand.hbm [shape: bf16[2,1024], index: 11, kind: output, shape index: {}]  }
   0x1   :  { %17 = vsyncpa [#allocation4], 0  ;;  %s40_s19 = sshll.u32 %s3100_s9, 4  ;;  %s2521_s20 = smov [#allocation2]   ;;  %s41_s19 = int_to_ptr.hbm [resolvable:$true] %s40_s19 }
   0x2   :  { %s42_s21 = sshll.u32 %s2521_s20, 4  ;;  %s2522_s22 = smov 512   ;;  %s43_s21 = int_to_ptr.vmem [resolvable:$true] %s42_s21 }
   0x3   :  { %s2523_s23 = smov 32  }
   0x4   :  { %48 = dma.hbm_to_vmem [thread:$0]  %s41_s19, 8192, %s43_s21, [#allocation3], %s2522_s22, %s2522_s22, %s2523_s23  }
   0x5   :  { %2517 = dma.done.wait [#allocation3], 8192  }
   0x6   :  { %2518 = vsyncadd [#allocation3], 4294959104  ;;  %v2524_v0 = vmov 1   ;;  %v2525_v1 = vmov 0   ;;  %v2526_v2 = vmov 2   ;;  %v56_v3 = vld [vmem:[%s3091_s0] sm:$0xff] }
   0x7   :  { %2427 = vset.pattern.permute.xlu1 %v2524_v0  ;;  %2426 = vset.pattern.permute.xlu0 %v2525_v1  ;;  %v57_v4 = vld [vmem:[%s3091_s0 + $0x8] sm:$0xff]  ;;  %v58_v5 = vld [vmem:[%s3091_s0 + $0x10] sm:$0xff]  ;;  %v59_v6 = vld [vmem:[%s3091_s0 + $0x18] sm:$0xff]  ;;  %vm444_vm0 = vcmask 523264   ;;  %vm1074_vm1 = vcmask 1040384   ;;  %vm1093_vm2 = vcmask 1041409  }
   0x8   :  { %2428 = vset.pattern.permute.xlu2 %v2526_v2  ;;  %171 = vperm.xlu1 %2427, %v56_v3   ;;  %v60_v7 = vld [vmem:[%s3091_s0 + $0x20] sm:$0xff]  ;;  %v61_v8 = vld [vmem:[%s3091_s0 + $0x28] sm:$0xff]  ;;  %v62_v9 = vld [vmem:[%s3091_s0 + $0x30] sm:$0xff]  ;;  %s1993_s27 = sshll.u32 %s3102_s11, 4  ;;  %s1994_s27 = int_to_ptr.hbm [resolvable:$true] %s1993_s27 }
   0x9   :  { %75 = vperm.xlu0 %2426, %v56_v3   ;;  %268 = vperm.xlu2 %2428, %v56_v3   ;;  %v63_v10 = vld [vmem:[%s3091_s0 + $0x38] sm:$0xff]  ;;  %v65_v11 = vld [vmem:[%s3091_s0 + $0x48] sm:$0xff]  ;;  %v66_v12 = vld [vmem:[%s3091_s0 + $0x50] sm:$0xff] }
   0xa   :  { %v64_v13 = vld [vmem:[%s3091_s0 + $0x40] sm:$0xff]  ;;  %v67_v14 = vld [vmem:[%s3091_s0 + $0x58] sm:$0xff]  ;;  %v2333_v17 = vld [vmem:[%s3094_s3 + $0x10] sm:$0xff] }
   0xb   :  { %v68_v15 = vld [vmem:[%s3091_s0 + $0x60] sm:$0xff]  ;;  %v2334_v16 = vld [vmem:[%s3094_s3 + $0x18] sm:$0xff]  ;;  %v69_v18 = vld [vmem:[%s3091_s0 + $0x68] sm:$0xff] }
   0xc   :  { %473 = vmatpush.bf16.msra.mxu0 %v2334_v16  ;;  %2407 = vmatpush.bf16.msra.mxu3 %v2334_v16  ;;  %v2332_v19 = vld [vmem:[%s3094_s3 + $0x8] sm:$0xff]  ;;  %v2331_v21 = vld [vmem:[%s3094_s3] sm:$0xff]  ;;  %v2676_v22 = vld [vmem:[%s3091_s0 + $0x70] sm:$0xff] }
   0xd   :  { %v72_v24 = vld [vmem:[%s3092_s1] sm:$0xff]  ;;  %v71_v52 = vld [vmem:[%s3091_s0 + $0x78] sm:$0xff] }
   0xe   :  { %v2684_v25 = vperm.slane %v72_v24, 1  ;;  %v2686_v26 = vperm.slane %v72_v24, 0  ;;  %v2688_v29 = vperm.slane %v72_v24, 2  ;;  %v2700_v40 = vld [vmem:[%s3093_s2] ss:$0 sm:$0xff] }
  0x10   :  { %175 = vperm.xlu1 %2427, %v57_v4   ;;  %474 = vmatpush.bf16.msra.mxu0 %v2333_v17 }
  0x11   :  { %80 = vperm.xlu0 %2426, %v57_v4   ;;  %272 = vperm.xlu2 %2428, %v57_v4  }
  0x12   :  { %2408 = vmatpush.bf16.msra.mxu3 %v2333_v17 }
  0x14   :  { %475 = vmatpush.bf16.msra.mxu0 %v2332_v19 }
  0x16   :  { %2409 = vmatpush.bf16.msra.mxu3 %v2332_v19 }
  0x18   :  { %2429 = vset.pattern.permute.xlu1 %v2525_v1  ;;  %476 = vmatpush.bf16.msra.mxu0 %v2331_v21 }
  0x19   :  { %85 = vperm.xlu0 %2426, %v58_v5   ;;  %90 = vperm.xlu1 %2429, %v59_v6  }
  0x1a   :  { %2430 = vset.pattern.permute.xlu2 %v2524_v0  ;;  %2410 = vmatpush.bf16.msra.mxu3 %v2331_v21 }
  0x1b   :  { %179 = vperm.xlu2 %2430, %v58_v5  }
  0x21   :  { %2431 = vset.pattern.permute.xlu0 %v2524_v0  ;;  %2432 = vset.pattern.permute.xlu1 %v2526_v2 }
  0x22   :  { %183 = vperm.xlu0 %2431, %v59_v6   ;;  %276 = vperm.xlu1 %2432, %v58_v5  }
  0x23   :  { %2433 = vset.pattern.permute.xlu2 %v2526_v2 }
  0x24   :  { %280 = vperm.xlu2 %2433, %v59_v6  }
  0x2a   :  { %187 = vperm.xlu0 %2431, %v60_v7   ;;  %2434 = vset.pattern.permute.xlu1 %v2525_v1 }
  0x2b   :  { %95 = vperm.xlu1 %2434, %v60_v7  }
  0x2c   :  { %2435 = vset.pattern.permute.xlu2 %v2525_v1 }
  0x2d   :  { %100 = vperm.xlu2 %2435, %v61_v8  }
  0x32   :  { %2438 = vset.pattern.permute.xlu0 %v2526_v2 }
  0x33   :  { %288 = vperm.xlu0 %2438, %v61_v8   ;;  %2436 = vset.pattern.permute.xlu1 %v2524_v0 }
  0x34   :  { %191 = vperm.xlu1 %2436, %v61_v8  }
  0x35   :  { %2437 = vset.pattern.permute.xlu2 %v2526_v2 }
  0x36   :  { %284 = vperm.xlu2 %2437, %v60_v7  }
  0x3b   :  { %292 = vperm.xlu0 %2438, %v62_v9  }
  0x3c   :  { %2439 = vset.pattern.permute.xlu1 %v2525_v1 }
  0x3d   :  { %105 = vperm.xlu1 %2439, %v62_v9  }
  0x3e   :  { %2440 = vset.pattern.permute.xlu2 %v2525_v1 }
  0x3f   :  { %110 = vperm.xlu2 %2440, %v63_v10  }
  0x43   :  { %2445 = vset.pattern.permute.xlu0 %v2525_v1 }
  0x44   :  { %120 = vperm.xlu0 %2445, %v65_v11  }
  0x45   :  { %2441 = vset.pattern.permute.xlu1 %v2524_v0 }
  0x46   :  { %195 = vperm.xlu1 %2441, %v62_v9  }
  0x47   :  { %2442 = vset.pattern.permute.xlu2 %v2524_v0 }
  0x48   :  { %199 = vperm.xlu2 %2442, %v63_v10  }
  0x4c   :  { %125 = vperm.xlu0 %2445, %v66_v12  }
  0x4e   :  { %2443 = vset.pattern.permute.xlu1 %v2526_v2 }
  0x4f   :  { %296 = vperm.xlu1 %2443, %v63_v10  }
  0x50   :  { %2444 = vset.pattern.permute.xlu2 %v2525_v1 }
  0x51   :  { %115 = vperm.xlu2 %2444, %v64_v13  }
  0x54   :  { %2452 = vset.pattern.permute.xlu0 %v2524_v0 }
  0x55   :  { %215 = vperm.xlu0 %2452, %v67_v14  }
  0x57   :  { %2446 = vset.pattern.permute.xlu1 %v2524_v0 }
  0x58   :  { %203 = vperm.xlu1 %2446, %v64_v13  }
  0x59   :  { %2447 = vset.pattern.permute.xlu2 %v2524_v0 }
  0x5a   :  { %207 = vperm.xlu2 %2447, %v65_v11  }
  0x5d   :  { %219 = vperm.xlu0 %2452, %v68_v15  }
  0x60   :  { %2448 = vset.pattern.permute.xlu1 %v2526_v2 }
  0x61   :  { %300 = vperm.xlu1 %2448, %v64_v13  }
  0x62   :  { %2449 = vset.pattern.permute.xlu2 %v2526_v2 }
  0x63   :  { %304 = vperm.xlu2 %2449, %v65_v11   ;;  %v269_v20 = vpop.permute.xlu2 %268 }
  0x64   :  { %v332_v33 = vmul.f32 %v2688_v29, %v269_v20 }
  0x65   :  { %2459 = vset.pattern.permute.xlu0 %v2526_v2 }
  0x66   :  { %320 = vperm.xlu0 %2459, %v69_v18  }
  0x69   :  { %2450 = vset.pattern.permute.xlu1 %v2525_v1 }
  0x6a   :  { %130 = vperm.xlu1 %2450, %v67_v14  }
  0x6b   :  { %2451 = vset.pattern.permute.xlu2 %v2524_v0  ;;  %v273_v23 = vpop.permute.xlu2 %272 }
  0x6c   :  { %211 = vperm.xlu2 %2451, %v66_v12   ;;  %v333_v41 = vmul.f32 %v2688_v29, %v273_v23 }
  0x6e   :  { %324 = vperm.xlu0 %2459, %v2676_v22  }
  0x72   :  { %2453 = vset.pattern.permute.xlu1 %v2526_v2 }
  0x73   :  { %308 = vperm.xlu1 %2453, %v66_v12  }
  0x74   :  { %2454 = vset.pattern.permute.xlu2 %v2526_v2 }
  0x75   :  { %312 = vperm.xlu2 %2454, %v67_v14   ;;  %v180_v32 = vpop.permute.xlu2 %179 }
  0x76   :  { %v237_v53 = vmul.f32 %v2684_v25, %v180_v32 }
  0x7a   :  { %v172_v27 = vpop.permute.xlu1 %171 }
  0x7b   :  { %v76_v28 = vpop.permute.xlu0 %75  ;;  %v235_v30 = vmul.f32 %v2684_v25, %v172_v27  ;;  %2455 = vset.pattern.permute.xlu1 %v2525_v1 }
  0x7c   :  { %v154_v31 = vmul.f32 %v2686_v26, %v76_v28  ;;  %135 = vperm.xlu1 %2455, %v68_v15  }
  0x7d   :  { %2456 = vset.pattern.permute.xlu2 %v2525_v1 }
  0x7e   :  { %140 = vperm.xlu2 %2456, %v69_v18   ;;  %v251_v34 = vadd.f32 %v235_v30, %v154_v31  ;;  %v281_v43 = vpop.permute.xlu2 %280 }
  0x7f   :  { %v335_v59 = vmul.f32 %v2688_v29, %v281_v43 }
  0x80   :  { %v348_v37 = vadd.f32 %v332_v33, %v251_v34 }
  0x82   :  { %v176_v35 = vpop.permute.xlu1 %175  ;;  %v368_v45 = vadd.f32 %v2700_v40, %v348_v37 }
  0x83   :  { %v81_v36 = vpop.permute.xlu0 %80  ;;  %v236_v38 = vmul.f32 %v2684_v25, %v176_v35 }
  0x84   :  { %v155_v39 = vmul.f32 %v2686_v26, %v81_v36  ;;  %2457 = vset.pattern.permute.xlu1 %v2524_v0  ;;  %v384_v49 = vmax.f32 %v368_v45, 0.0 }
  0x85   :  { %223 = vperm.xlu1 %2457, %v69_v18  }
  0x86   :  { %v252_v42 = vadd.f32 %v236_v38, %v155_v39  ;;  %2458 = vset.pattern.permute.xlu2 %v2526_v2 }
  0x87   :  { %316 = vperm.xlu2 %2458, %v68_v15   ;;  %v101_v55 = vpop.permute.xlu2 %100 }
  0x88   :  { %v349_v44 = vadd.f32 %v333_v41, %v252_v42  ;;  %v159_v18 = vmul.f32 %v2686_v26, %v101_v55 }
  0x8a   :  { %v369_v46 = vadd.f32 %v2700_v40, %v349_v44 }
  0x8b   :  { %v86_v47 = vpop.permute.xlu0 %85  ;;  %v91_v48 = vpop.permute.xlu1 %90 }
  0x8c   :  { %v385_v50 = vmax.f32 %v369_v46, 0.0  ;;  %v156_v54 = vmul.f32 %v2686_v26, %v86_v47  ;;  %v157_v58 = vmul.f32 %v2686_v26, %v91_v48 }
  0x8d   :  { %2460 = vset.pattern.permute.xlu1 %v2525_v1 }
  0x8e   :  { %v400_v51 = vpack.c.bf16 %v385_v50, %v384_v49  ;;  %145 = vperm.xlu1 %2460, %v2676_v22   ;;  %v253_v56 = vadd.f32 %v237_v53, %v156_v54 }
  0x8f   :  { %2461 = vset.pattern.permute.xlu2 %v2525_v1 }
  0x90   :  { %2019 = vmatmul.msk.bf16.vlgmr.msra.gmra.mxu0 %vm444_vm0, %v400_v51  ;;  %150 = vperm.xlu2 %2461, %v71_v52   ;;  %v285_v5 = vpop.permute.xlu2 %284 }
  0x91   :  { %v336_v15 = vmul.f32 %v2688_v29, %v285_v5 }
  0x94   :  { %v184_v57 = vpop.permute.xlu0 %183  ;;  %v277_v61 = vpop.permute.xlu1 %276 }
  0x95   :  { %v238_v60 = vmul.f32 %v2684_v25, %v184_v57  ;;  %v334_v62 = vmul.f32 %v2688_v29, %v277_v61 }
  0x96   :  { %2462 = vset.pattern.permute.xlu1 %v2524_v0 }
  0x97   :  { %v254_v63 = vadd.f32 %v238_v60, %v157_v58  ;;  %v350_v1 = vadd.f32 %v334_v62, %v253_v56  ;;  %227 = vperm.xlu1 %2462, %v2676_v22  }
  0x98   :  { %2463 = vset.pattern.permute.xlu2 %v2524_v0 }
  0x99   :  { %v351_v3 = vadd.f32 %v335_v59, %v254_v63  ;;  %231 = vperm.xlu2 %2463, %v71_v52   ;;  %v370_v4 = vadd.f32 %v2700_v40, %v350_v1  ;;  %v111_v0 = vpop.permute.xlu2 %110 }
  0x9a   :  { %v161_v41 = vmul.f32 %v2686_v26, %v111_v0 }
  0x9b   :  { %v371_v6 = vadd.f32 %v2700_v40, %v351_v3  ;;  %v386_v7 = vmax.f32 %v370_v4, 0.0 }
  0x9c   :  { %v188_v8 = vpop.permute.xlu0 %187 }
  0x9d   :  { %v387_v9 = vmax.f32 %v371_v6, 0.0  ;;  %v96_v10 = vpop.permute.xlu1 %95  ;;  %v239_v13 = vmul.f32 %v2684_v25, %v188_v8 }
  0x9e   :  { %v158_v12 = vmul.f32 %v2686_v26, %v96_v10 }
  0x9f   :  { %v401_v11 = vpack.c.bf16 %v387_v9, %v386_v7  ;;  %2464 = vset.pattern.permute.xlu1 %v2526_v2 }
  0xa0   :  { %328 = vperm.xlu1 %2464, %v71_v52   ;;  %v255_v14 = vadd.f32 %v239_v13, %v158_v12 }
  0xa1   :  { %2020 = vmatmul.msk.bf16.gmra.mxu0 %vm444_vm0, %v401_v11 }
  0xa2   :  { %v352_v19 = vadd.f32 %v336_v15, %v255_v14  ;;  %v200_v24 = vpop.permute.xlu2 %199 }
  0xa3   :  { %v242_v42 = vmul.f32 %v2684_v25, %v200_v24 }
  0xa4   :  { %v372_v23 = vadd.f32 %v2700_v40, %v352_v19 }
  0xa5   :  { %v289_v16 = vpop.permute.xlu0 %288  ;;  %v258_v46 = vadd.f32 %v242_v42, %v161_v41  ;;  %v2336_v42 = vld [vmem:[%s3096_s5 + $0x8] sm:$0xff] }
  0xa6   :  { %v192_v17 = vpop.permute.xlu1 %191  ;;  %v337_v21 = vmul.f32 %v2688_v29, %v289_v16  ;;  %v388_v28 = vmax.f32 %v372_v23, 0.0 }
  0xa7   :  { %v240_v20 = vmul.f32 %v2684_v25, %v192_v17 }
  0xa9   :  { %v256_v22 = vadd.f32 %v240_v20, %v159_v18 }
  0xab   :  { %v353_v2 = vadd.f32 %v337_v21, %v256_v22  ;;  %v116_v33 = vpop.permute.xlu2 %115 }
  0xac   :  { %v162_v1 = vmul.f32 %v2686_v26, %v116_v33 }
  0xad   :  { %v373_v27 = vadd.f32 %v2700_v40, %v353_v2  ;;  %v293_v36 = vpop.permute.xlu0 %292 }
  0xae   :  { %v338_v39 = vmul.f32 %v2688_v29, %v293_v36 }
  0xaf   :  { %v389_v30 = vmax.f32 %v373_v27, 0.0  ;;  %v106_v31 = vpop.permute.xlu1 %105 }
  0xb0   :  { %v160_v37 = vmul.f32 %v2686_v26, %v106_v31  ;;  %v2338_v31 = vld [vmem:[%s3096_s5 + $0x18] sm:$0xff] }
  0xb1   :  { %v402_v32 = vpack.c.bf16 %v389_v30, %v388_v28  ;;  %606 = vmatpush.bf16.msrb.mxu0 %v2338_v31  ;;  %2411 = vmatpush.bf16.msra.mxu1 %v2338_v31 }
  0xb3   :  { %2021 = vmatmul.msk.bf16.vlgmr.msra.gmra.mxu3 %vm444_vm0, %v402_v32 }
  0xb4   :  { %v208_v43 = vpop.permute.xlu2 %207 }
  0xb5   :  { %v244_v54 = vmul.f32 %v2684_v25, %v208_v43 }
  0xb6   :  { %v121_v50 = vpop.permute.xlu0 %120 }
  0xb7   :  { %v163_v55 = vmul.f32 %v2686_v26, %v121_v50 }
  0xb8   :  { %v196_v34 = vpop.permute.xlu1 %195 }
  0xb9   :  { %v241_v35 = vmul.f32 %v2684_v25, %v196_v34  ;;  %v260_v59 = vadd.f32 %v244_v54, %v163_v55 }
  0xbb   :  { %v257_v38 = vadd.f32 %v241_v35, %v160_v37  ;;  %v2337_v37 = vld [vmem:[%s3096_s5 + $0x10] sm:$0xff] }
  0xbc   :  { %607 = vmatpush.bf16.msrb.mxu0 %v2337_v37  ;;  %2412 = vmatpush.bf16.msra.mxu1 %v2337_v37 }
  0xbd   :  { %v354_v44 = vadd.f32 %v338_v39, %v257_v38  ;;  %v305_v56 = vpop.permute.xlu2 %304 }
  0xbe   :  { %v341_v60 = vmul.f32 %v2688_v29, %v305_v56  ;;  %v126_v61 = vpop.permute.xlu0 %125 }
  0xbf   :  { %v374_v48 = vadd.f32 %v2700_v40, %v354_v44  ;;  %v164_v19 = vmul.f32 %v2686_v26, %v126_v61 }
  0xc0   :  { %v357_v63 = vadd.f32 %v341_v60, %v260_v59  ;;  %608 = vmatpush.bf16.msrb.mxu0 %v2336_v42  ;;  %2413 = vmatpush.bf16.msra.mxu1 %v2336_v42 }
  0xc1   :  { %v297_v45 = vpop.permute.xlu1 %296  ;;  %v390_v52 = vmax.f32 %v374_v48, 0.0 }
  0xc2   :  { %v339_v47 = vmul.f32 %v2688_v29, %v297_v45  ;;  %v377_v6 = vadd.f32 %v2700_v40, %v357_v63 }
  0xc4   :  { %v355_v49 = vadd.f32 %v339_v47, %v258_v46  ;;  %v393_v9 = vmax.f32 %v377_v6, 0.0  ;;  %v2335_v46 = vld [vmem:[%s3096_s5] sm:$0xff] }
  0xc5   :  { %609 = vmatpush.bf16.msrb.mxu0 %v2335_v46  ;;  %2414 = vmatpush.bf16.msra.mxu1 %v2335_v46 }
  0xc6   :  { %v375_v51 = vadd.f32 %v2700_v40, %v355_v49  ;;  %v212_v4 = vpop.permute.xlu2 %211 }
  0xc7   :  { %v216_v11 = vpop.permute.xlu0 %215  ;;  %v245_v20 = vmul.f32 %v2684_v25, %v212_v4 }
  0xc8   :  { %v391_v53 = vmax.f32 %v375_v51, 0.0  ;;  %v246_v0 = vmul.f32 %v2684_v25, %v216_v11 }
  0xc9   :  { %v261_v23 = vadd.f32 %v245_v20, %v164_v19 }
  0xca   :  { %v204_v57 = vpop.permute.xlu1 %203  ;;  %v403_v58 = vpack.c.bf16 %v391_v53, %v390_v52 }
  0xcb   :  { %v243_v62 = vmul.f32 %v2684_v25, %v204_v57 }
  0xcc   :  { %2022 = vmatmul.msk.bf16.gmra.mxu3 %vm444_vm0, %v403_v58 }
  0xcd   :  { %v259_v5 = vadd.f32 %v243_v62, %v162_v1 }
  0xcf   :  { %v313_v16 = vpop.permute.xlu2 %312  ;;  %v220_v34 = vpop.permute.xlu0 %219 }
  0xd0   :  { %v343_v18 = vmul.f32 %v2688_v29, %v313_v16  ;;  %v247_v39 = vmul.f32 %v2684_v25, %v220_v34 }
  0xd3   :  { %v301_v3 = vpop.permute.xlu1 %300 }
  0xd4   :  { %v340_v7 = vmul.f32 %v2688_v29, %v301_v3 }
  0xd6   :  { %v356_v8 = vadd.f32 %v340_v7, %v259_v5 }
  0xd8   :  { %v376_v10 = vadd.f32 %v2700_v40, %v356_v8  ;;  %v141_v24 = vpop.permute.xlu2 %140  ;;  %v321_v45 = vpop.permute.xlu0 %320 }
  0xd9   :  { %v167_v48 = vmul.f32 %v2686_v26, %v141_v24  ;;  %v345_v51 = vmul.f32 %v2688_v29, %v321_v45 }
  0xda   :  { %v392_v12 = vmax.f32 %v376_v10, 0.0 }
  0xdc   :  { %v131_v13 = vpop.permute.xlu1 %130  ;;  %v404_v14 = vpack.c.bf16 %v393_v9, %v392_v12  ;;  %v2792_v9 = vld [vmem:[%s3095_s4] ss:$0 sm:$0xff] }
  0xdd   :  { %v165_v15 = vmul.f32 %v2686_v26, %v131_v13 }
  0xde   :  { %2023 = vmatmul.msk.bf16.gmra.mxu3 %vm444_vm0, %v404_v14 }
  0xdf   :  { %v262_v17 = vadd.f32 %v246_v0, %v165_v15 }
  0xe0   :  { %v325_v1 = vpop.permute.xlu0 %324 }
  0xe1   :  { %v359_v21 = vadd.f32 %v343_v18, %v262_v17  ;;  %v317_v41 = vpop.permute.xlu2 %316  ;;  %v346_v7 = vmul.f32 %v2688_v29, %v325_v1 }
  0xe2   :  { %v344_v44 = vmul.f32 %v2688_v29, %v317_v41 }
  0xe3   :  { %v379_v27 = vadd.f32 %v2700_v40, %v359_v21 }
  0xe5   :  { %v309_v22 = vpop.permute.xlu1 %308  ;;  %v395_v32 = vmax.f32 %v379_v27, 0.0 }
  0xe6   :  { %v342_v2 = vmul.f32 %v2688_v29, %v309_v22 }
  0xe8   :  { %v358_v28 = vadd.f32 %v342_v2, %v261_v23 }
  0xea   :  { %v378_v30 = vadd.f32 %v2700_v40, %v358_v28  ;;  %v151_v59 = vpop.permute.xlu2 %150 }
  0xeb   :  { %v169_v6 = vmul.f32 %v2686_v26, %v151_v59 }
  0xec   :  { %v394_v33 = vmax.f32 %v378_v30, 0.0 }
  0xee   :  { %v136_v35 = vpop.permute.xlu1 %135  ;;  %v405_v36 = vpack.c.bf16 %v395_v32, %v394_v33 }
  0xef   :  { %v166_v38 = vmul.f32 %v2686_v26, %v136_v35 }
  0xf0   :  { %2024 = vmatmul.msk.bf16.gmra.mxu3 %vm444_vm0, %v405_v36 }
  0xf1   :  { %v263_v43 = vadd.f32 %v247_v39, %v166_v38 }
  0xf3   :  { %v360_v49 = vadd.f32 %v344_v44, %v263_v43  ;;  %v232_v3 = vpop.permute.xlu2 %231 }
  0xf4   :  { %v250_v8 = vmul.f32 %v2684_v25, %v232_v3 }
  0xf5   :  { %v380_v53 = vadd.f32 %v2700_v40, %v360_v49 }
  0xf6   :  { %v266_v12 = vadd.f32 %v250_v8, %v169_v6 }
  0xf7   :  { %v224_v47 = vpop.permute.xlu1 %223  ;;  %v396_v56 = vmax.f32 %v380_v53, 0.0  ;;  %v2342_v53 = vld [vmem:[%s3098_s7 + $0x18] sm:$0xff] }
  0xf8   :  { %v248_v50 = vmul.f32 %v2684_v25, %v224_v47  ;;  %739 = vmatpush.bf16.msra.mxu0 %v2342_v53  ;;  %2415 = vmatpush.bf16.msra.mxu2 %v2342_v53 }
  0xfa   :  { %v264_v52 = vadd.f32 %v248_v50, %v167_v48 }
  0xfc   :  { %v361_v54 = vadd.f32 %v345_v51, %v264_v52 }
  0xfe   :  { %v381_v55 = vadd.f32 %v2700_v40, %v361_v54 }
 0x100   :  { %v397_v57 = vmax.f32 %v381_v55, 0.0  ;;  %v146_v58 = vpop.permute.xlu1 %145  ;;  %v2341_v55 = vld [vmem:[%s3098_s7 + $0x10] sm:$0xff] }
 0x101   :  { %v168_v63 = vmul.f32 %v2686_v26, %v146_v58  ;;  %740 = vmatpush.bf16.msra.mxu0 %v2341_v55  ;;  %2416 = vmatpush.bf16.msra.mxu2 %v2341_v55  ;;  %v2371_v55 = vld [vmem:[#allocation2 + $0x18c] sm:$0xf] }
 0x102   :  { %v406_v60 = vpack.c.bf16 %v397_v57, %v396_v56 }
 0x104   :  { %2025 = vmatmul.msk.bf16.gmra.mxu3 %vm444_vm0, %v406_v60  ;;  %v2340_v60 = vld [vmem:[%s3098_s7 + $0x8] sm:$0xff] }
 0x105   :  { %741 = vmatpush.bf16.msra.mxu0 %v2340_v60  ;;  %2417 = vmatpush.bf16.msra.mxu2 %v2340_v60 }
 0x109   :  { %v228_v61 = vpop.permute.xlu1 %227 }
 0x10a   :  { %v249_v62 = vmul.f32 %v2684_v25, %v228_v61 }
 0x10c   :  { %v265_v5 = vadd.f32 %v249_v62, %v168_v63  ;;  %v2339_v62 = vld [vmem:[%s3098_s7] sm:$0xff] }
 0x10d   :  { %v478_v4 = vpop.f32.mrf.mxu0  ;;  %742 = vmatpush.bf16.msra.mxu0 %v2339_v62  ;;  %2418 = vmatpush.bf16.msra.mxu2 %v2339_v62 }
 0x10e   :  { %v362_v10 = vadd.f32 %v346_v7, %v265_v5  ;;  %v479_v13 = vadd.f32 %v2792_v9, %v478_v4 }
 0x110   :  { %v382_v16 = vadd.f32 %v2700_v40, %v362_v10  ;;  %v518_v17 = vmax.f32 %v479_v13, 0.0  ;;  %v2834_v10 = vld [vmem:[%s3097_s6] ss:$0 sm:$0xff] }
 0x112   :  { %v329_v11 = vpop.permute.xlu1 %328  ;;  %v398_v21 = vmax.f32 %v382_v16, 0.0 }
 0x113   :  { %v347_v0 = vmul.f32 %v2688_v29, %v329_v11 }
 0x115   :  { %v480_v14 = vpop.f32.mrf.mxu0  ;;  %v363_v15 = vadd.f32 %v347_v0, %v266_v12 }
 0x116   :  { %v481_v26 = vadd.f32 %v2792_v9, %v480_v14 }
 0x117   :  { %v383_v25 = vadd.f32 %v2700_v40, %v363_v15 }
 0x118   :  { %v519_v18 = vmax.f32 %v481_v26, 0.0 }
 0x119   :  { %v399_v19 = vmax.f32 %v383_v25, 0.0 }
 0x11a   :  { %v534_v20 = vpack.c.bf16 %v519_v18, %v518_v17 }
 0x11b   :  { %v407_v22 = vpack.c.bf16 %v399_v19, %v398_v21 }
 0x11c   :  { %2043 = vmatmul.msk.bf16.vlgmr.msrb.gmra.mxu0 %vm444_vm0, %v534_v20 }
 0x11d   :  { %2026 = vmatmul.msk.bf16.gmra.mxu3 %vm444_vm0, %v407_v22 }
 0x11e   :  { %v483_v23 = vpop.f32.mrf.mxu0 }
 0x11f   :  { %v484_v29 = vadd.f32 %v2792_v9, %v483_v23 }
 0x121   :  { %v520_v27 = vmax.f32 %v484_v29, 0.0 }
 0x126   :  { %v485_v2 = vpop.f32.mrf.mxu0 }
 0x127   :  { %v486_v24 = vadd.f32 %v2792_v9, %v485_v2 }
 0x129   :  { %v521_v28 = vmax.f32 %v486_v24, 0.0 }
 0x12b   :  { %v535_v30 = vpack.c.bf16 %v521_v28, %v520_v27 }
 0x12d   :  { %2044 = vmatmul.msk.bf16.gmra.mxu0 %vm444_vm0, %v535_v30 }
 0x136   :  { %v488_v40 = vpop.f32.mrf.mxu3 }
 0x137   :  { %v489_v31 = vadd.f32 %v2792_v9, %v488_v40 }
 0x139   :  { %v522_v34 = vmax.f32 %v489_v31, 0.0 }
 0x13e   :  { %v490_v32 = vpop.f32.mrf.mxu3 }
 0x13f   :  { %v491_v33 = vadd.f32 %v2792_v9, %v490_v32 }
 0x141   :  { %v523_v35 = vmax.f32 %v491_v33, 0.0 }
 0x143   :  { %v536_v36 = vpack.c.bf16 %v523_v35, %v522_v34  ;;  %v2133_v35 = vld [vmem:[#allocation2 + $0x1c0] sm:$0xf] }
 0x145   :  { %2045 = vmatmul.msk.bf16.vlgmr.msra.gmra.mxu1 %vm444_vm0, %v536_v36  ;;  %v2358_v36 = vld [vmem:[#allocation2 + $0x1dc] sm:$0xf0] }
 0x14f   :  { %v493_v37 = vpop.f32.mrf.mxu3 }
 0x150   :  { %v494_v38 = vadd.f32 %v2792_v9, %v493_v37  ;;  %v2134_v37 = vor.u32 %v2358_v36, %v2133_v35  ;;  %v2103_v35 = vld [vmem:[#allocation2 + $0xe0] sm:$0xf0] }
 0x152   :  { %v524_v42 = vmax.f32 %v494_v38, 0.0  ;;  %904 = vmatpush.bf16.msrb.mxu3 %v2134_v37  ;;  %v2165_v37 = vld [vmem:[#allocation2 + $0xc8] sm:$0xf] }
 0x157   :  { %v495_v39 = vpop.f32.mrf.mxu3 }
 0x158   :  { %v496_v41 = vadd.f32 %v2792_v9, %v495_v39  ;;  %v2373_v39 = vld [vmem:[#allocation2 + $0x1cc] sm:$0xf] }
 0x15a   :  { %v525_v43 = vmax.f32 %v496_v41, 0.0  ;;  %v2199_v41 = vld [vmem:[#allocation2 + $0x1e8] sm:$0xf0] }
 0x15c   :  { %v537_v44 = vpack.c.bf16 %v525_v43, %v524_v42  ;;  %v2202_v43 = vor.u32 %v2373_v39, %v2199_v41  ;;  %v2093_v41 = vld [vmem:[#allocation2 + $0x80] sm:$0xf] }
 0x15e   :  { %2046 = vmatmul.msk.bf16.gmra.mxu1 %vm444_vm0, %v537_v44  ;;  %1249 = vmatpush.bf16.msrb.mxu2 %v2202_v43  ;;  %v2347_v43 = vld [vmem:[#allocation2 + $0x84] sm:$0xf] }
 0x161   :  { %v498_v45 = vpop.f32.mrf.mxu3 }
 0x162   :  { %v499_v46 = vadd.f32 %v2792_v9, %v498_v45 }
 0x164   :  { %v526_v49 = vmax.f32 %v499_v46, 0.0 }
 0x169   :  { %v500_v47 = vpop.f32.mrf.mxu3 }
 0x16a   :  { %v501_v48 = vadd.f32 %v2792_v9, %v500_v47 }
 0x16c   :  { %v527_v50 = vmax.f32 %v501_v48, 0.0  ;;  %v2125_v48 = vld [vmem:[#allocation2 + $0x180] sm:$0xf] }
 0x16e   :  { %v538_v51 = vpack.c.bf16 %v527_v50, %v526_v49  ;;  %v2356_v49 = vld [vmem:[#allocation2 + $0x19c] sm:$0xf0]  ;;  %v2197_v50 = vld [vmem:[#allocation2 + $0x1c8] sm:$0xf] }
 0x170   :  { %2047 = vmatmul.msk.bf16.gmra.mxu1 %vm444_vm0, %v538_v51  ;;  %v2126_v51 = vor.u32 %v2356_v49, %v2125_v48  ;;  %v2364_v48 = vld [vmem:[#allocation2 + $0xa4] sm:$0xf0] }
 0x172   :  { %905 = vmatpush.bf16.msrb.mxu3 %v2126_v51 }
 0x173   :  { %v503_v52 = vpop.f32.mrf.mxu3 }
 0x174   :  { %v504_v54 = vadd.f32 %v2792_v9, %v503_v52  ;;  %v2374_v52 = vld [vmem:[#allocation2 + $0x1e4] sm:$0xf0] }
 0x175   :  { %v2198_v53 = vor.u32 %v2374_v52, %v2197_v50  ;;  %v2367_v52 = vld [vmem:[#allocation2 + $0x10c] sm:$0xf] }
 0x176   :  { %v528_v58 = vmax.f32 %v504_v54, 0.0 }
 0x177   :  { %1200 = vmatpush.bf16.msrb.mxu1 %v2198_v53  ;;  %v2175_v53 = vld [vmem:[#allocation2 + $0x128] sm:$0xf0] }
 0x17b   :  { %v505_v56 = vpop.f32.mrf.mxu3 }
 0x17c   :  { %v506_v57 = vadd.f32 %v2792_v9, %v505_v56  ;;  %v2191_v56 = vld [vmem:[#allocation2 + $0x1a8] sm:$0xf0] }
 0x17e   :  { %v529_v59 = vmax.f32 %v506_v57, 0.0  ;;  %v2194_v57 = vor.u32 %v2371_v55, %v2191_v56  ;;  %v2178_v55 = vor.u32 %v2367_v52, %v2175_v53  ;;  %v2085_v56 = vld [vmem:[#allocation2 + $0x40] sm:$0xf] }
 0x180   :  { %v539_v61 = vpack.c.bf16 %v529_v59, %v528_v58  ;;  %1250 = vmatpush.bf16.msrb.mxu2 %v2194_v57  ;;  %v2357_v58 = vld [vmem:[#allocation2 + $0x1c4] sm:$0xf]  ;;  %v2346_v57 = vld [vmem:[#allocation2 + $0x5c] sm:$0xf0] }
 0x181   :  { %v2135_v59 = vld [vmem:[#allocation2 + $0x1e0] sm:$0xf0] }
 0x182   :  { %2048 = vmatmul.msk.bf16.gmra.mxu1 %vm444_vm0, %v539_v61  ;;  %v2138_v60 = vor.u32 %v2357_v58, %v2135_v59  ;;  %v2345_v58 = vld [vmem:[#allocation2 + $0x44] sm:$0xf] }
 0x184   :  { %953 = vmatpush.bf16.msrb.mxu0 %v2138_v60 }
 0x187   :  { %v508_v63 = vpop.f32.mrf.mxu3 }
 0x188   :  { %v509_v1 = vadd.f32 %v2792_v9, %v508_v63  ;;  %v2189_v63 = vld [vmem:[#allocation2 + $0x188] sm:$0xf] }
 0x18a   :  { %v530_v5 = vmax.f32 %v509_v1, 0.0  ;;  %v2372_v1 = vld [vmem:[#allocation2 + $0x1a4] sm:$0xf0] }
 0x18f   :  { %v510_v3 = vpop.f32.mrf.mxu3 }
 0x190   :  { %v511_v4 = vadd.f32 %v2792_v9, %v510_v3  ;;  %v2355_v3 = vld [vmem:[#allocation2 + $0x184] sm:$0xf] }
 0x192   :  { %v531_v6 = vmax.f32 %v511_v4, 0.0 }
 0x194   :  { %v540_v7 = vpack.c.bf16 %v531_v6, %v530_v5  ;;  %v2117_v5 = vld [vmem:[#allocation2 + $0x140] sm:$0xf] }
 0x195   :  { %v2354_v6 = vld [vmem:[#allocation2 + $0x15c] sm:$0xf0] }
 0x196   :  { %2049 = vmatmul.msk.bf16.gmra.mxu1 %vm444_vm0, %v540_v7  ;;  %v2190_v7 = vor.u32 %v2372_v1, %v2189_v63  ;;  %v2149_v63 = vld [vmem:[#allocation2 + $0x48] sm:$0xf] }
 0x198   :  { %1201 = vmatpush.bf16.msrb.mxu1 %v2190_v7  ;;  %v2344_v7 = vld [vmem:[#allocation2 + $0x1c] sm:$0xf0] }
 0x199   :  { %v611_v8 = vpop.f32.mrf.mxu0 }
 0x19a   :  { %v612_v11 = vadd.f32 %v2834_v10, %v611_v8  ;;  %v2127_v8 = vld [vmem:[#allocation2 + $0x1a0] sm:$0xf0] }
 0x19c   :  { %v651_v14 = vmax.f32 %v612_v11, 0.0  ;;  %v2118_v11 = vor.u32 %v2354_v6, %v2117_v5  ;;  %v2077_v6 = vld [vmem:[#allocation2] sm:$0xf] }
 0x19e   :  { %906 = vmatpush.bf16.msrb.mxu3 %v2118_v11  ;;  %v2078_v11 = vor.u32 %v2344_v7, %v2077_v6  ;;  %v2387_v6 = vld [vmem:[#allocation2 + $0x194] sm:$0xf] }
 0x1a0   :  { %v513_v12 = vpop.f32.mrf.mxu3 }
 0x1a1   :  { %v613_v13 = vpop.f32.mrf.mxu0  ;;  %v514_v16 = vadd.f32 %v2792_v9, %v513_v12  ;;  %v2130_v12 = vor.u32 %v2355_v3, %v2127_v8  ;;  %v2362_v3 = vld [vmem:[#allocation2 + $0x64] sm:$0xf0]  ;;  %v2343_v8 = vld [vmem:[#allocation2 + $0x4] sm:$0xf] }
 0x1a2   :  { %v614_v0 = vadd.f32 %v2834_v10, %v613_v13  ;;  %v2150_v5 = vor.u32 %v2362_v3, %v2149_v63  ;;  %v2325_v63 = vld [vmem:[#allocation2 + $0x1d8] sm:$0xf] }
 0x1a3   :  { %v532_v19 = vmax.f32 %v514_v16, 0.0  ;;  %954 = vmatpush.bf16.msrb.mxu0 %v2130_v12  ;;  %v2079_v12 = vld [vmem:[#allocation2 + $0x20] sm:$0xf0] }
 0x1a4   :  { %v652_v15 = vmax.f32 %v614_v0, 0.0 }
 0x1a6   :  { %v667_v26 = vpack.c.bf16 %v652_v15, %v651_v14  ;;  %v2353_v14 = vld [vmem:[#allocation2 + $0x144] sm:$0xf] }
 0x1a7   :  { %v2119_v15 = vld [vmem:[#allocation2 + $0x160] sm:$0xf0] }
 0x1a8   :  { %2067 = vmatmul.msk.bf16.vlgmr.msra.gmra.mxu0 %vm444_vm0, %v667_v26  ;;  %v515_v17 = vpop.f32.mrf.mxu3  ;;  %v2181_v26 = vld [vmem:[#allocation2 + $0x148] sm:$0xf] }
 0x1a9   :  { %v516_v25 = vadd.f32 %v2792_v9, %v515_v17  ;;  %v2122_v17 = vor.u32 %v2353_v14, %v2119_v15  ;;  %v2082_v14 = vor.u32 %v2343_v8, %v2079_v12  ;;  %v2255_v8 = vld [vmem:[#allocation2 + $0x1b0] sm:$0xf0] }
 0x1aa   :  { %v616_v18 = vpop.f32.mrf.mxu0 }
 0x1ab   :  { %v533_v20 = vmax.f32 %v516_v25, 0.0  ;;  %v617_v22 = vadd.f32 %v2834_v10, %v616_v18  ;;  %v2370_v25 = vld [vmem:[#allocation2 + $0x164] sm:$0xf0]  ;;  %955 = vmatpush.bf16.msrb.mxu0 %v2122_v17  ;;  %v2167_v17 = vld [vmem:[#allocation2 + $0xe8] sm:$0xf0] }
 0x1ac   :  { %v2182_v18 = vor.u32 %v2370_v25, %v2181_v26 }
 0x1ad   :  { %v541_v21 = vpack.c.bf16 %v533_v20, %v532_v19  ;;  %v653_v2 = vmax.f32 %v617_v22, 0.0  ;;  %v2109_v19 = vld [vmem:[#allocation2 + $0x100] sm:$0xf]  ;;  %v2369_v22 = vld [vmem:[#allocation2 + $0x14c] sm:$0xf] }
 0x1ae   :  { %1202 = vmatpush.bf16.msrb.mxu1 %v2182_v18  ;;  %v2352_v20 = vld [vmem:[#allocation2 + $0x11c] sm:$0xf0] }
 0x1af   :  { %2050 = vmatmul.msk.bf16.gmra.mxu1 %vm444_vm0, %v541_v21  ;;  %v2351_v21 = vld [vmem:[#allocation2 + $0x104] sm:$0xf] }
 0x1b2   :  { %v618_v23 = vpop.f32.mrf.mxu0 }
 0x1b3   :  { %v619_v29 = vadd.f32 %v2834_v10, %v618_v23  ;;  %v2183_v23 = vld [vmem:[#allocation2 + $0x168] sm:$0xf0] }
 0x1b5   :  { %v654_v24 = vmax.f32 %v619_v29, 0.0  ;;  %v2110_v29 = vor.u32 %v2352_v20, %v2109_v19 }
 0x1b7   :  { %v668_v27 = vpack.c.bf16 %v654_v24, %v653_v2  ;;  %v2111_v2 = vld [vmem:[#allocation2 + $0x120] sm:$0xf0]  ;;  %907 = vmatpush.bf16.msrb.mxu3 %v2110_v29  ;;  %v2159_v29 = vld [vmem:[#allocation2 + $0xa8] sm:$0xf0] }
 0x1b9   :  { %2068 = vmatmul.msk.bf16.gmra.mxu0 %vm444_vm0, %v668_v27  ;;  %v2186_v27 = vor.u32 %v2369_v22, %v2183_v23  ;;  %v2363_v23 = vld [vmem:[#allocation2 + $0x8c] sm:$0xf] }
 0x1bb   :  { %1251 = vmatpush.bf16.msrb.mxu2 %v2186_v27  ;;  %v2361_v27 = vld [vmem:[#allocation2 + $0x4c] sm:$0xf] }
 0x1bf   :  { %1252 = vmatpush.bf16.msrb.mxu2 %v2178_v55  ;;  %v2390_v55 = vld [vmem:[#allocation2 + $0x1ec] sm:$0xf0] }
 0x1c2   :  { %v621_v28 = vpop.f32.mrf.mxu1 }
 0x1c3   :  { %v622_v30 = vadd.f32 %v2834_v10, %v621_v28  ;;  %v2114_v28 = vor.u32 %v2351_v21, %v2111_v2  ;;  %v2162_v2 = vor.u32 %v2363_v23, %v2159_v29 }
 0x1c5   :  { %v655_v31 = vmax.f32 %v622_v30, 0.0  ;;  %v2173_v30 = vld [vmem:[#allocation2 + $0x108] sm:$0xf]  ;;  %956 = vmatpush.bf16.msrb.mxu0 %v2114_v28  ;;  %v2151_v28 = vld [vmem:[#allocation2 + $0x68] sm:$0xf0] }
 0x1ca   :  { %v623_v9 = vpop.f32.mrf.mxu1 }
 0x1cb   :  { %v624_v40 = vadd.f32 %v2834_v10, %v623_v9  ;;  %v2368_v9 = vld [vmem:[#allocation2 + $0x124] sm:$0xf0] }
 0x1cd   :  { %v656_v32 = vmax.f32 %v624_v40, 0.0  ;;  %v2174_v40 = vor.u32 %v2368_v9, %v2173_v30  ;;  %v2154_v30 = vor.u32 %v2361_v27, %v2151_v28  ;;  %v2401_v27 = vld [vmem:[#allocation2 + $0x15c] sm:$0xf] }
 0x1cf   :  { %v669_v33 = vpack.c.bf16 %v656_v32, %v655_v31  ;;  %v2101_v31 = vld [vmem:[#allocation2 + $0xc0] sm:$0xf]  ;;  %1203 = vmatpush.bf16.msrb.mxu1 %v2174_v40  ;;  %v2359_v40 = vld [vmem:[#allocation2 + $0xc] sm:$0xf] }
 0x1d0   :  { %v2350_v32 = vld [vmem:[#allocation2 + $0xdc] sm:$0xf0] }
 0x1d1   :  { %2069 = vmatmul.msk.bf16.vlgmr.msra.gmra.mxu2 %vm444_vm0, %v669_v33  ;;  %v2349_v33 = vld [vmem:[#allocation2 + $0xc4] sm:$0xf] }
 0x1d2   :  { %v2106_v36 = vor.u32 %v2349_v33, %v2103_v35  ;;  %v2863_v33 = vld [vmem:[%s3099_s8] ss:$0 sm:$0xff] }
 0x1d4   :  { %957 = vmatpush.bf16.msrb.mxu0 %v2106_v36 }
 0x1db   :  { %v626_v34 = vpop.f32.mrf.mxu1 }
 0x1dc   :  { %v627_v38 = vadd.f32 %v2834_v10, %v626_v34  ;;  %v2102_v34 = vor.u32 %v2350_v32, %v2101_v31  ;;  %v2143_v31 = vld [vmem:[#allocation2 + $0x28] sm:$0xf0] }
 0x1dd   :  { %v2146_v32 = vor.u32 %v2359_v40, %v2143_v31  ;;  %v2309_v40 = vld [vmem:[#allocation2 + $0x158] sm:$0xf] }
 0x1de   :  { %v657_v45 = vmax.f32 %v627_v38, 0.0  ;;  %v2366_v38 = vld [vmem:[#allocation2 + $0xe4] sm:$0xf0]  ;;  %908 = vmatpush.bf16.msrb.mxu3 %v2102_v34  ;;  %v2402_v31 = vld [vmem:[#allocation2 + $0x174] sm:$0xf0] }
 0x1df   :  { %v2166_v39 = vor.u32 %v2366_v38, %v2165_v37 }
 0x1e1   :  { %1204 = vmatpush.bf16.msrb.mxu1 %v2166_v39 }
 0x1e3   :  { %v628_v42 = vpop.f32.mrf.mxu1 }
 0x1e4   :  { %v629_v44 = vadd.f32 %v2834_v10, %v628_v42  ;;  %v2348_v42 = vld [vmem:[#allocation2 + $0x9c] sm:$0xf0] }
 0x1e6   :  { %v658_v46 = vmax.f32 %v629_v44, 0.0 }
 0x1e8   :  { %v670_v47 = vpack.c.bf16 %v658_v46, %v657_v45  ;;  %v2094_v45 = vor.u32 %v2348_v42, %v2093_v41  ;;  %v2095_v46 = vld [vmem:[#allocation2 + $0xa0] sm:$0xf0] }
 0x1e9   :  { %v2098_v50 = vor.u32 %v2347_v43, %v2095_v46 }
 0x1ea   :  { %2070 = vmatmul.msk.bf16.gmra.mxu2 %vm444_vm0, %v670_v47  ;;  %v2157_v47 = vld [vmem:[#allocation2 + $0x88] sm:$0xf]  ;;  %909 = vmatpush.bf16.msrb.mxu3 %v2094_v45 }
 0x1eb   :  { %v2158_v51 = vor.u32 %v2364_v48, %v2157_v47  ;;  %958 = vmatpush.bf16.msrb.mxu0 %v2098_v50 }
 0x1ed   :  { %v631_v54 = vpop.f32.mrf.mxu1  ;;  %1205 = vmatpush.bf16.msrb.mxu1 %v2158_v51 }
 0x1ee   :  { %v632_v61 = vadd.f32 %v2834_v10, %v631_v54 }
 0x1f0   :  { %v659_v13 = vmax.f32 %v632_v61, 0.0  ;;  %v2086_v61 = vor.u32 %v2346_v57, %v2085_v56 }
 0x1f1   :  { %1206 = vmatpush.bf16.msrb.mxu1 %v2150_v5  ;;  %v2388_v5 = vld [vmem:[#allocation2 + $0x1ac] sm:$0xf0] }
 0x1f2   :  { %910 = vmatpush.bf16.msrb.mxu3 %v2086_v61  ;;  %v2327_v61 = vld [vmem:[#allocation2 + $0x1f8] sm:$0xf0] }
 0x1f5   :  { %v633_v62 = vpop.f32.mrf.mxu1 }
 0x1f6   :  { %v634_v4 = vadd.f32 %v2834_v10, %v633_v62  ;;  %v2087_v62 = vld [vmem:[#allocation2 + $0x60] sm:$0xf0]  ;;  %911 = vmatpush.bf16.msrb.mxu3 %v2078_v11  ;;  %v2258_v11 = vor.u32 %v2387_v6, %v2255_v8 }
 0x1f7   :  { %v2090_v1 = vor.u32 %v2345_v58, %v2087_v62  ;;  %v2263_v58 = vld [vmem:[#allocation2 + $0x1f0] sm:$0xf0] }
 0x1f8   :  { %v660_v0 = vmax.f32 %v634_v4, 0.0 }
 0x1f9   :  { %959 = vmatpush.bf16.msrb.mxu0 %v2090_v1  ;;  %v2406_v1 = vld [vmem:[#allocation2 + $0x1f4] sm:$0xf0] }
 0x1fa   :  { %v671_v16 = vpack.c.bf16 %v660_v0, %v659_v13  ;;  %v2141_v13 = vld [vmem:[#allocation2 + $0x8] sm:$0xf]  ;;  %v2326_v3 = vor.u32 %v2406_v1, %v2325_v63 }
 0x1fb   :  { %v2360_v0 = vld [vmem:[#allocation2 + $0x24] sm:$0xf0] }
 0x1fc   :  { %2071 = vmatmul.msk.bf16.gmra.mxu2 %vm444_vm0, %v671_v16  ;;  %v2142_v15 = vor.u32 %v2360_v0, %v2141_v13  ;;  %v2365_v16 = vld [vmem:[#allocation2 + $0xcc] sm:$0xf]  ;;  %v2403_v13 = vld [vmem:[#allocation2 + $0x19c] sm:$0xf] }
 0x1fd   :  { %960 = vmatpush.bf16.msrb.mxu0 %v2082_v14  ;;  %v2170_v25 = vor.u32 %v2365_v16, %v2167_v17  ;;  %v2319_v0 = vld [vmem:[#allocation2 + $0x1b8] sm:$0xf0]  ;;  %v2317_v14 = vld [vmem:[#allocation2 + $0x198] sm:$0xf] }
 0x1fe   :  { %1207 = vmatpush.bf16.msrb.mxu1 %v2142_v15  ;;  %v2404_v16 = vld [vmem:[#allocation2 + $0x1b4] sm:$0xf0] }
 0x1ff   :  { %v636_v24 = vpop.f32.mrf.mxu1  ;;  %1253 = vmatpush.bf16.msrb.mxu2 %v2170_v25  ;;  %v2318_v25 = vor.u32 %v2404_v16, %v2317_v14  ;;  %v2221_v14 = vld [vmem:[#allocation2 + $0x90] sm:$0xf] }
 0x200   :  { %v637_v44 = vadd.f32 %v2834_v10, %v636_v24 }
 0x202   :  { %v661_v59 = vmax.f32 %v637_v44, 0.0  ;;  %1788 = vmatpush.bf16.msra.mxu1 %v2326_v3  ;;  %v2397_v3 = vld [vmem:[#allocation2 + $0xdc] sm:$0xf] }
 0x203   :  { %1254 = vmatpush.bf16.msrb.mxu2 %v2162_v2  ;;  %v2385_v2 = vld [vmem:[#allocation2 + $0x154] sm:$0xf] }
 0x206   :  { %1789 = vmatpush.bf16.msra.mxu1 %v2318_v25 }
 0x207   :  { %v638_v49 = vpop.f32.mrf.mxu1  ;;  %1255 = vmatpush.bf16.msrb.mxu2 %v2154_v30  ;;  %v2311_v30 = vld [vmem:[#allocation2 + $0x178] sm:$0xf0] }
 0x208   :  { %v639_v54 = vadd.f32 %v2834_v10, %v638_v49 }
 0x20a   :  { %v662_v60 = vmax.f32 %v639_v54, 0.0  ;;  %v2261_v54 = vld [vmem:[#allocation2 + $0x1d0] sm:$0xf] }
 0x20b   :  { %1256 = vmatpush.bf16.msrb.mxu2 %v2146_v32  ;;  %v2262_v57 = vor.u32 %v2390_v55, %v2261_v54  ;;  %v2237_v32 = vld [vmem:[#allocation2 + $0x110] sm:$0xf] }
 0x20c   :  { %v672_v4 = vpack.c.bf16 %v662_v60, %v661_v59  ;;  %v2405_v59 = vld [vmem:[#allocation2 + $0x1dc] sm:$0xf]  ;;  %v2229_v54 = vld [vmem:[#allocation2 + $0xd0] sm:$0xf] }
 0x20d   :  { %1494 = vmatpush.bf16.msra.mxu3 %v2262_v57  ;;  %v2330_v62 = vor.u32 %v2405_v59, %v2327_v61  ;;  %v2381_v59 = vld [vmem:[#allocation2 + $0xd4] sm:$0xf] }
 0x20e   :  { %2072 = vmatmul.msk.bf16.gmra.mxu2 %vm444_vm0, %v672_v4  ;;  %v2253_v4 = vld [vmem:[#allocation2 + $0x190] sm:$0xf] }
 0x20f   :  { %1837 = vmatpush.bf16.msra.mxu2 %v2330_v62  ;;  %v2254_v7 = vor.u32 %v2388_v5, %v2253_v4  ;;  %v2295_v4 = vld [vmem:[#allocation2 + $0xf8] sm:$0xf0]  ;;  %v2293_v5 = vld [vmem:[#allocation2 + $0xd8] sm:$0xf] }
 0x210   :  { %v2298_v6 = vor.u32 %v2397_v3, %v2295_v4 }
 0x211   :  { %1495 = vmatpush.bf16.msra.mxu3 %v2254_v7  ;;  %v2398_v7 = vld [vmem:[#allocation2 + $0xf4] sm:$0xf0] }
 0x213   :  { %v641_v26 = vpop.f32.mrf.mxu1 }
 0x214   :  { %v642_v18 = vadd.f32 %v2834_v10, %v641_v26  ;;  %v2322_v26 = vor.u32 %v2403_v13, %v2319_v0 }
 0x216   :  { %v663_v21 = vmax.f32 %v642_v18, 0.0  ;;  %1838 = vmatpush.bf16.msra.mxu2 %v2322_v26  ;;  %v2379_v26 = vld [vmem:[#allocation2 + $0x94] sm:$0xf] }
 0x21b   :  { %v643_v19 = vpop.f32.mrf.mxu1 }
 0x21c   :  { %v644_v20 = vadd.f32 %v2834_v10, %v643_v19  ;;  %v2245_v19 = vld [vmem:[#allocation2 + $0x150] sm:$0xf] }
 0x21e   :  { %v664_v22 = vmax.f32 %v644_v20, 0.0  ;;  %v2386_v20 = vld [vmem:[#allocation2 + $0x16c] sm:$0xf0] }
 0x220   :  { %v673_v24 = vpack.c.bf16 %v664_v22, %v663_v21  ;;  %v2246_v21 = vor.u32 %v2386_v20, %v2245_v19  ;;  %v2287_v19 = vld [vmem:[#allocation2 + $0xb8] sm:$0xf0] }
 0x222   :  { %2073 = vmatmul.msk.bf16.gmra.mxu2 %vm444_vm0, %v673_v24  ;;  %1496 = vmatpush.bf16.msra.mxu3 %v2246_v21  ;;  %v2247_v24 = vld [vmem:[#allocation2 + $0x170] sm:$0xf0] }
 0x223   :  { %v2250_v28 = vor.u32 %v2385_v2, %v2247_v24  ;;  %v2285_v2 = vld [vmem:[#allocation2 + $0x98] sm:$0xf] }
 0x224   :  { %v2396_v24 = vld [vmem:[#allocation2 + $0xb4] sm:$0xf0] }
 0x225   :  { %v744_v9 = vpop.f32.mrf.mxu0 }
 0x226   :  { %v745_v34 = vadd.f32 %v2863_v33, %v744_v9  ;;  %v2314_v9 = vor.u32 %v2401_v27, %v2311_v30  ;;  %v2213_v27 = vld [vmem:[#allocation2 + $0x50] sm:$0xf] }
 0x227   :  { %v2378_v30 = vld [vmem:[#allocation2 + $0x6c] sm:$0xf0] }
 0x228   :  { %v784_v38 = vmax.f32 %v745_v34, 0.0  ;;  %1839 = vmatpush.bf16.msra.mxu2 %v2314_v9 }
 0x22c   :  { %v646_v35 = vpop.f32.mrf.mxu1 }
 0x22d   :  { %v746_v36 = vpop.f32.mrf.mxu0  ;;  %v647_v42 = vadd.f32 %v2834_v10, %v646_v35  ;;  %v2310_v35 = vor.u32 %v2402_v31, %v2309_v40  ;;  %v2214_v31 = vor.u32 %v2378_v30, %v2213_v27 }
 0x22e   :  { %v747_v37 = vadd.f32 %v2863_v33, %v746_v36  ;;  %v2384_v36 = vld [vmem:[#allocation2 + $0x12c] sm:$0xf0] }
 0x22f   :  { %v665_v46 = vmax.f32 %v647_v42, 0.0  ;;  %1790 = vmatpush.bf16.msra.mxu1 %v2310_v35  ;;  %v2239_v42 = vld [vmem:[#allocation2 + $0x130] sm:$0xf0] }
 0x230   :  { %v785_v39 = vmax.f32 %v747_v37, 0.0  ;;  %v2238_v37 = vor.u32 %v2384_v36, %v2237_v32  ;;  %v2215_v35 = vld [vmem:[#allocation2 + $0x70] sm:$0xf0]  ;;  %v2393_v36 = vld [vmem:[#allocation2 + $0x5c] sm:$0xf] }
 0x232   :  { %v2867_v41 = vpack.c.bf16 %v785_v39, %v784_v38  ;;  %1497 = vmatpush.bf16.msra.mxu3 %v2238_v37  ;;  %v2383_v39 = vld [vmem:[#allocation2 + $0x114] sm:$0xf] }
 0x234   :  { %912 = vmatmul.bf16.vlgmr.msrb.gmra.mxu3 %v2867_v41  ;;  %961 = vmatmul.bf16.vlgmr.msrb.gmra.mxu0 %v2867_v41  ;;  %v648_v43 = vpop.f32.mrf.mxu1 }
 0x235   :  { %1208 = vmatmul.bf16.vlgmr.msrb.gmra.mxu1 %v2867_v41  ;;  %v649_v44 = vadd.f32 %v2834_v10, %v648_v43  ;;  %v2389_v10 = vld [vmem:[#allocation2 + $0x1d4] sm:$0xf]  ;;  %v2399_v43 = vld [vmem:[#allocation2 + $0x11c] sm:$0xf] }
 0x236   :  { %v749_v45 = vpop.f32.mrf.mxu0  ;;  %v2266_v60 = vor.u32 %v2389_v10, %v2263_v58  ;;  %v2382_v10 = vld [vmem:[#allocation2 + $0xec] sm:$0xf0] }
 0x237   :  { %v666_v47 = vmax.f32 %v649_v44, 0.0  ;;  %v750_v49 = vadd.f32 %v2863_v33, %v749_v45  ;;  %v2242_v45 = vor.u32 %v2383_v39, %v2239_v42  ;;  %v2230_v58 = vor.u32 %v2382_v10, %v2229_v54 }
 0x238   :  { %1543 = vmatpush.bf16.msra.mxu0 %v2266_v60  ;;  %v2231_v60 = vld [vmem:[#allocation2 + $0xf0] sm:$0xf0] }
 0x239   :  { %v674_v48 = vpack.c.bf16 %v666_v47, %v665_v46  ;;  %v786_v52 = vmax.f32 %v750_v49, 0.0  ;;  %v2303_v46 = vld [vmem:[#allocation2 + $0x138] sm:$0xf0]  ;;  %1498 = vmatpush.bf16.msra.mxu3 %v2230_v58  ;;  %v2234_v61 = vor.u32 %v2381_v59, %v2231_v60 }
 0x23a   :  { %v2391_v58 = vld [vmem:[#allocation2 + $0x1c] sm:$0xf] }
 0x23b   :  { %2074 = vmatmul.msk.bf16.gmra.mxu2 %vm444_vm0, %v674_v48  ;;  %v2306_v48 = vor.u32 %v2399_v43, %v2303_v46  ;;  %v2277_v43 = vld [vmem:[#allocation2 + $0x58] sm:$0xf]  ;;  %v2271_v59 = vld [vmem:[#allocation2 + $0x38] sm:$0xf0] }
 0x23c   :  { %1544 = vmatpush.bf16.msra.mxu0 %v2258_v11 }
 0x23d   :  { %1840 = vmatpush.bf16.msra.mxu2 %v2306_v48 }
 0x23e   :  { %v751_v50 = vpop.f32.mrf.mxu0 }
 0x23f   :  { %v752_v51 = vadd.f32 %v2863_v33, %v751_v50 }
 0x240   :  { %1545 = vmatpush.bf16.msra.mxu0 %v2250_v28  ;;  %v2286_v28 = vor.u32 %v2396_v24, %v2285_v2 }
 0x241   :  { %v787_v53 = vmax.f32 %v752_v51, 0.0  ;;  %1841 = vmatpush.bf16.msra.mxu2 %v2298_v6 }
 0x243   :  { %v2877_v56 = vpack.c.bf16 %v787_v53, %v786_v52  ;;  %v2301_v52 = vld [vmem:[#allocation2 + $0x118] sm:$0xf] }
 0x244   :  { %1546 = vmatpush.bf16.msra.mxu0 %v2242_v45  ;;  %v2400_v53 = vld [vmem:[#allocation2 + $0x134] sm:$0xf0] }
 0x245   :  { %917 = vmatmul.bf16.gmra.mxu3 %v2877_v56  ;;  %966 = vmatmul.bf16.gmra.mxu0 %v2877_v56  ;;  %v2302_v57 = vor.u32 %v2400_v53, %v2301_v52 }
 0x246   :  { %1213 = vmatmul.bf16.gmra.mxu1 %v2877_v56 }
 0x247   :  { %1791 = vmatpush.bf16.msra.mxu1 %v2302_v57  ;;  %v2207_v57 = vld [vmem:[#allocation2 + $0x30] sm:$0xf0] }
 0x248   :  { %1547 = vmatpush.bf16.msra.mxu0 %v2234_v61  ;;  %v2274_v61 = vor.u32 %v2391_v58, %v2271_v59 }
 0x24b   :  { %1257 = vmatmul.bf16.vlgmr.msrb.gmra.mxu2 %v2867_v41 }
 0x254   :  { %v754_v12 = vpop.f32.mrf.mxu2 }
 0x255   :  { %v755_v15 = vadd.f32 %v2863_v33, %v754_v12  ;;  %v2294_v12 = vor.u32 %v2398_v7, %v2293_v5 }
 0x257   :  { %v788_v22 = vmax.f32 %v755_v15, 0.0  ;;  %1792 = vmatpush.bf16.msra.mxu1 %v2294_v12  ;;  %v2380_v15 = vld [vmem:[#allocation2 + $0xac] sm:$0xf0] }
 0x258   :  { %v2222_v16 = vor.u32 %v2380_v15, %v2221_v14 }
 0x25a   :  { %1499 = vmatpush.bf16.msra.mxu3 %v2222_v16 }
 0x25b   :  { %1262 = vmatmul.bf16.gmra.mxu2 %v2877_v56  ;;  %1793 = vmatpush.bf16.msra.mxu1 %v2286_v28 }
 0x25c   :  { %v756_v17 = vpop.f32.mrf.mxu2 }
 0x25d   :  { %v757_v18 = vadd.f32 %v2863_v33, %v756_v17  ;;  %v2223_v17 = vld [vmem:[#allocation2 + $0xb0] sm:$0xf0] }
 0x25e   :  { %v2226_v25 = vor.u32 %v2379_v26, %v2223_v17  ;;  %1500 = vmatpush.bf16.msra.mxu3 %v2214_v31 }
 0x25f   :  { %v789_v23 = vmax.f32 %v757_v18, 0.0  ;;  %v2395_v18 = vld [vmem:[#allocation2 + $0x9c] sm:$0xf] }
 0x260   :  { %1548 = vmatpush.bf16.msra.mxu0 %v2226_v25  ;;  %v2290_v20 = vor.u32 %v2395_v18, %v2287_v19 }
 0x261   :  { %v2886_v29 = vpack.c.bf16 %v789_v23, %v788_v22 }
 0x262   :  { %1842 = vmatpush.bf16.msra.mxu2 %v2290_v20 }
 0x263   :  { %922 = vmatmul.bf16.gmra.mxu3 %v2886_v29  ;;  %971 = vmatmul.bf16.gmra.mxu0 %v2886_v29 }
 0x264   :  { %1218 = vmatmul.bf16.gmra.mxu1 %v2886_v29 }
 0x26b   :  { %1267 = vmatmul.bf16.gmra.mxu2 %v2886_v29 }
 0x26d   :  { %v759_v34 = vpop.f32.mrf.mxu2 }
 0x26e   :  { %v760_v38 = vadd.f32 %v2863_v33, %v759_v34  ;;  %v2377_v34 = vld [vmem:[#allocation2 + $0x54] sm:$0xf] }
 0x26f   :  { %v2218_v37 = vor.u32 %v2377_v34, %v2215_v35 }
 0x270   :  { %v790_v49 = vmax.f32 %v760_v38, 0.0  ;;  %v2279_v38 = vld [vmem:[#allocation2 + $0x78] sm:$0xf0] }
 0x271   :  { %v2282_v42 = vor.u32 %v2393_v36, %v2279_v38  ;;  %1549 = vmatpush.bf16.msra.mxu0 %v2218_v37 }
 0x273   :  { %1843 = vmatpush.bf16.msra.mxu2 %v2282_v42 }
 0x275   :  { %v761_v44 = vpop.f32.mrf.mxu2 }
 0x276   :  { %v762_v47 = vadd.f32 %v2863_v33, %v761_v44  ;;  %v2394_v44 = vld [vmem:[#allocation2 + $0x74] sm:$0xf0] }
 0x277   :  { %v2278_v46 = vor.u32 %v2394_v44, %v2277_v43  ;;  %1844 = vmatpush.bf16.msra.mxu2 %v2274_v61 }
 0x278   :  { %v791_v50 = vmax.f32 %v762_v47, 0.0 }
 0x279   :  { %1794 = vmatpush.bf16.msra.mxu1 %v2278_v46 }
 0x27a   :  { %v2894_v51 = vpack.c.bf16 %v791_v50, %v790_v49  ;;  %v2205_v49 = vld [vmem:[#allocation2 + $0x10] sm:$0xf] }
 0x27b   :  { %v2376_v50 = vld [vmem:[#allocation2 + $0x2c] sm:$0xf0] }
 0x27c   :  { %927 = vmatmul.bf16.gmra.mxu3 %v2894_v51  ;;  %976 = vmatmul.bf16.gmra.mxu0 %v2894_v51  ;;  %v2206_v52 = vor.u32 %v2376_v50, %v2205_v49 }
 0x27d   :  { %1223 = vmatmul.bf16.gmra.mxu1 %v2894_v51  ;;  %1272 = vmatmul.bf16.gmra.mxu2 %v2894_v51 }
 0x27e   :  { %1501 = vmatpush.bf16.msra.mxu3 %v2206_v52 }
 0x27f   :  { %v764_v55 = vpop.f32.mrf.mxu2 }
 0x280   :  { %v765_v62 = vadd.f32 %v2863_v33, %v764_v55  ;;  %v2375_v55 = vld [vmem:[#allocation2 + $0x14] sm:$0xf] }
 0x281   :  { %v2210_v10 = vor.u32 %v2375_v55, %v2207_v57 }
 0x282   :  { %v792_v8 = vmax.f32 %v765_v62, 0.0  ;;  %v2269_v62 = vld [vmem:[#allocation2 + $0x18] sm:$0xf] }
 0x283   :  { %1550 = vmatpush.bf16.msra.mxu0 %v2210_v10 }
 0x287   :  { %v766_v63 = vpop.f32.mrf.mxu2 }
 0x288   :  { %v767_v1 = vadd.f32 %v2863_v33, %v766_v63  ;;  %v2392_v63 = vld [vmem:[#allocation2 + $0x34] sm:$0xf0] }
 0x28a   :  { %v793_v11 = vmax.f32 %v767_v1, 0.0  ;;  %v2270_v1 = vor.u32 %v2392_v63, %v2269_v62 }
 0x28c   :  { %v2902_v13 = vpack.c.bf16 %v793_v11, %v792_v8  ;;  %1795 = vmatpush.bf16.msra.mxu1 %v2270_v1 }
 0x28e   :  { %932 = vmatmul.bf16.gmra.mxu3 %v2902_v13  ;;  %981 = vmatmul.bf16.gmra.mxu0 %v2902_v13 }
 0x28f   :  { %1228 = vmatmul.bf16.gmra.mxu1 %v2902_v13  ;;  %1277 = vmatmul.bf16.gmra.mxu2 %v2902_v13 }
 0x291   :  { %v769_v0 = vpop.f32.mrf.mxu2 }
 0x292   :  { %v770_v21 = vadd.f32 %v2863_v33, %v769_v0 }
 0x294   :  { %v794_v9 = vmax.f32 %v770_v21, 0.0 }
 0x299   :  { %v771_v22 = vpop.f32.mrf.mxu2 }
 0x29a   :  { %v772_v23 = vadd.f32 %v2863_v33, %v771_v22 }
 0x29c   :  { %v795_v40 = vmax.f32 %v772_v23, 0.0 }
 0x29e   :  { %v2910_v32 = vpack.c.bf16 %v795_v40, %v794_v9 }
 0x2a0   :  { %937 = vmatmul.bf16.gmra.mxu3 %v2910_v32  ;;  %986 = vmatmul.bf16.gmra.mxu0 %v2910_v32 }
 0x2a1   :  { %1233 = vmatmul.bf16.gmra.mxu1 %v2910_v32  ;;  %1282 = vmatmul.bf16.gmra.mxu2 %v2910_v32 }
 0x2a5   :  { %v774_v39 = vpop.f32.mrf.mxu2 }
 0x2a6   :  { %v775_v45 = vadd.f32 %v2863_v33, %v774_v39 }
 0x2a8   :  { %v796_v53 = vmax.f32 %v775_v45, 0.0 }
 0x2ad   :  { %v776_v47 = vpop.f32.mrf.mxu2 }
 0x2ae   :  { %v777_v48 = vadd.f32 %v2863_v33, %v776_v47 }
 0x2b0   :  { %v797_v54 = vmax.f32 %v777_v48, 0.0 }
 0x2b1   :  { %v962_v4 = vpop.f32.mrf.mxu0 }
 0x2b2   :  { %v2918_v60 = vpack.c.bf16 %v797_v54, %v796_v53  ;;  %v1209_v5 = vpop.f32.mrf.mxu1 }
 0x2b4   :  { %942 = vmatmul.bf16.gmra.mxu3 %v2918_v60  ;;  %991 = vmatmul.bf16.gmra.mxu0 %v2918_v60 }
 0x2b5   :  { %1238 = vmatmul.bf16.gmra.mxu1 %v2918_v60  ;;  %1287 = vmatmul.bf16.gmra.mxu2 %v2918_v60 }
 0x2b7   :  { %v913_v8 = vpop.f32.mrf.mxu3 }
 0x2b9   :  { %v964_v14 = vpop.f32.mrf.mxu0 }
 0x2ba   :  { %v1211_v26 = vpop.f32.mrf.mxu1 }
 0x2bb   :  { %v1298_v34 = vmax.f32 %v1209_v5, %v1211_v26 }
 0x2be   :  { %v779_v3 = vpop.f32.mrf.mxu2 }
 0x2bf   :  { %v780_v6 = vadd.f32 %v2863_v33, %v779_v3  ;;  %v915_v17 = vpop.f32.mrf.mxu3 }
 0x2c0   :  { %v1002_v44 = vmax.f32 %v913_v8, %v915_v17 }
 0x2c1   :  { %v798_v12 = vmax.f32 %v780_v6, 0.0 }
 0x2c2   :  { %v967_v25 = vpop.f32.mrf.mxu0 }
 0x2c3   :  { %v1214_v18 = vpop.f32.mrf.mxu1 }
 0x2c4   :  { %v1299_v37 = vmax.f32 %v1298_v34, %v1214_v18 }
 0x2c6   :  { %v781_v7 = vpop.f32.mrf.mxu2 }
 0x2c7   :  { %v782_v11 = vadd.f32 %v2863_v33, %v781_v7 }
 0x2c8   :  { %v918_v33 = vpop.f32.mrf.mxu3 }
 0x2c9   :  { %v799_v0 = vmax.f32 %v782_v11, 0.0 }
 0x2ca   :  { %v969_v21 = vpop.f32.mrf.mxu0 }
 0x2cb   :  { %v2926_v15 = vpack.c.bf16 %v799_v0, %v798_v12  ;;  %v1216_v22 = vpop.f32.mrf.mxu1 }
 0x2cc   :  { %v1300_v43 = vmax.f32 %v1299_v37, %v1216_v22  ;;  %v2947_v22 = vld [vmem:[%s3101_s10] sm:$0x3] }
 0x2cd   :  { %947 = vmatmul.bf16.gmra.mxu3 %v2926_v15  ;;  %996 = vmatmul.bf16.gmra.mxu0 %v2926_v15  ;;  %v1056_v34 = vperm.slane %v2947_v22, 0 }
 0x2ce   :  { %1243 = vmatmul.bf16.gmra.mxu1 %v2926_v15  ;;  %1292 = vmatmul.bf16.gmra.mxu2 %v2926_v15  ;;  %v1258_v16 = vpop.f32.mrf.mxu2 }
 0x2d0   :  { %v920_v23 = vpop.f32.mrf.mxu3 }
 0x2d6   :  { %v1260_v19 = vpop.f32.mrf.mxu2 }
 0x2d7   :  { %v1311_v46 = vmax.f32 %v1258_v16, %v1260_v19 }
 0x2dd   :  { %1502 = vmatmul.bf16.vlgmr.msra.gmra.mxu3 %v2867_v41  ;;  %1551 = vmatmul.bf16.vlgmr.msra.gmra.mxu0 %v2867_v41 }
 0x2de   :  { %1796 = vmatmul.bf16.vlgmr.msra.gmra.mxu1 %v2867_v41  ;;  %1845 = vmatmul.bf16.vlgmr.msra.gmra.mxu2 %v2867_v41  ;;  %v1263_v20 = vpop.f32.mrf.mxu2  ;;  %v1015_v41 = vmax.f32 %v962_v4, %v964_v14 }
 0x2df   :  { %v1312_v49 = vmax.f32 %v1311_v46, %v1263_v20 }
 0x2e0   :  { %v972_v24 = vpop.f32.mrf.mxu0  ;;  %v1016_v36 = vmax.f32 %v1015_v41, %v967_v25 }
 0x2e1   :  { %v1219_v27 = vpop.f32.mrf.mxu1 }
 0x2e2   :  { %v1017_v39 = vmax.f32 %v1016_v36, %v969_v21  ;;  %v1301_v47 = vmax.f32 %v1300_v43, %v1219_v27 }
 0x2e4   :  { %v1018_v45 = vmax.f32 %v1017_v39, %v972_v24 }
 0x2e6   :  { %v1265_v2 = vpop.f32.mrf.mxu2  ;;  %v923_v28 = vpop.f32.mrf.mxu3 }
 0x2e7   :  { %v1313_v57 = vmax.f32 %v1312_v49, %v1265_v2 }
 0x2e8   :  { %v974_v9 = vpop.f32.mrf.mxu0 }
 0x2e9   :  { %v1221_v40 = vpop.f32.mrf.mxu1  ;;  %v1019_v48 = vmax.f32 %v1018_v45, %v974_v9 }
 0x2ea   :  { %v1302_v50 = vmax.f32 %v1301_v47, %v1221_v40  ;;  %v2957_v40 = vld [vmem:[%s3101_s10 + $0x2] sm:$0x3] }
 0x2eb   :  { %v1353_v36 = vperm.slane %v2957_v40, 1 }
 0x2ed   :  { %1507 = vmatmul.bf16.gmra.mxu3 %v2877_v56  ;;  %1556 = vmatmul.bf16.gmra.mxu0 %v2877_v56 }
 0x2ee   :  { %1801 = vmatmul.bf16.gmra.mxu1 %v2877_v56  ;;  %1850 = vmatmul.bf16.gmra.mxu2 %v2877_v56  ;;  %v1268_v30 = vpop.f32.mrf.mxu2  ;;  %v925_v35 = vpop.f32.mrf.mxu3  ;;  %v1003_v56 = vmax.f32 %v1002_v44, %v918_v33 }
 0x2ef   :  { %v1314_v63 = vmax.f32 %v1313_v57, %v1268_v30 }
 0x2f0   :  { %v1004_v53 = vmax.f32 %v1003_v56, %v920_v23 }
 0x2f2   :  { %v1005_v59 = vmax.f32 %v1004_v53, %v923_v28  ;;  %v1057_v28 = vperm.slane %v2947_v22, 1 }
 0x2f4   :  { %v1006_v3 = vmax.f32 %v1005_v59, %v925_v35 }
 0x2f6   :  { %v1270_v31 = vpop.f32.mrf.mxu2 }
 0x2f7   :  { %v1315_v5 = vmax.f32 %v1314_v63, %v1270_v31 }
 0x2f9   :  { %v977_v38 = vpop.f32.mrf.mxu0 }
 0x2fa   :  { %v1224_v42 = vpop.f32.mrf.mxu1  ;;  %v1020_v54 = vmax.f32 %v1019_v48, %v977_v38  ;;  %v1352_v38 = vperm.slane %v2957_v40, 0 }
 0x2fb   :  { %v1303_v10 = vmax.f32 %v1302_v50, %v1224_v42 }
 0x2fd   :  { %1512 = vmatmul.bf16.gmra.mxu3 %v2886_v29  ;;  %1561 = vmatmul.bf16.gmra.mxu0 %v2886_v29 }
 0x2fe   :  { %1806 = vmatmul.bf16.gmra.mxu1 %v2886_v29  ;;  %1855 = vmatmul.bf16.gmra.mxu2 %v2886_v29 }
 0x2ff   :  { %v928_v52 = vpop.f32.mrf.mxu3 }
 0x300   :  { %v1273_v55 = vpop.f32.mrf.mxu2  ;;  %v1007_v7 = vmax.f32 %v1006_v3, %v928_v52 }
 0x301   :  { %v979_v58 = vpop.f32.mrf.mxu0  ;;  %v1316_v8 = vmax.f32 %v1315_v5, %v1273_v55 }
 0x302   :  { %v1021_v61 = vmax.f32 %v1020_v54, %v979_v58  ;;  %v1226_v62 = vpop.f32.mrf.mxu1 }
 0x303   :  { %v1304_v1 = vmax.f32 %v1303_v10, %v1226_v62 }
 0x304   :  { %v1022_v4 = vrot.slane %v1021_v61, 4 }
 0x305   :  { %v1305_v6 = vrot.slane %v1304_v1, 4 }
 0x306   :  { %v1023_v29 = vmax.f32 %v1021_v61, %v1022_v4 }
 0x307   :  { %v1306_v11 = vmax.f32 %v1304_v1, %v1305_v6  ;;  %v930_v12 = vpop.f32.mrf.mxu3 }
 0x308   :  { %v1024_v0 = vrot.slane %v1023_v29, 2  ;;  %v1008_v14 = vmax.f32 %v1007_v7, %v930_v12  ;;  %v1275_v26 = vpop.f32.mrf.mxu2 }
 0x309   :  { %v1307_v16 = vrot.slane %v1306_v11, 2  ;;  %v1317_v17 = vmax.f32 %v1316_v8, %v1275_v26 }
 0x30a   :  { %v1025_v25 = vmax.f32 %v1023_v29, %v1024_v0  ;;  %v1009_v18 = vrot.slane %v1008_v14, 4 }
 0x30b   :  { %v1318_v19 = vrot.slane %v1317_v17, 4  ;;  %v1308_v20 = vmax.f32 %v1306_v11, %v1307_v16  ;;  %v982_v42 = vpop.f32.mrf.mxu0 }
 0x30c   :  { %v1026_v33 = vrot.slane %v1025_v25, 1  ;;  %v1010_v21 = vmax.f32 %v1008_v14, %v1009_v18  ;;  %v1229_v44 = vpop.f32.mrf.mxu1 }
 0x30d   :  { %v1319_v23 = vmax.f32 %v1317_v17, %v1318_v19  ;;  %1517 = vmatmul.bf16.gmra.mxu3 %v2894_v51  ;;  %1566 = vmatmul.bf16.gmra.mxu0 %v2894_v51  ;;  %v1309_v30 = vrot.slane %v1308_v20, 1 }
 0x30e   :  { %v1011_v2 = vrot.slane %v1010_v21, 2  ;;  %1811 = vmatmul.bf16.gmra.mxu1 %v2894_v51  ;;  %1860 = vmatmul.bf16.gmra.mxu2 %v2894_v51  ;;  %v1027_v27 = vmax.f32 %v1025_v25, %v1026_v33 }
 0x30f   :  { %v1320_v24 = vrot.slane %v1319_v23, 2  ;;  %v1310_v37 = vmax.f32 %v1308_v20, %v1309_v30 }
 0x310   :  { %v1012_v9 = vmax.f32 %v1010_v21, %v1011_v2  ;;  %v1061_v51 = vadd.f32 %v1057_v28, %v1027_v27 }
 0x311   :  { %v1321_v41 = vmax.f32 %v1319_v23, %v1320_v24  ;;  %v1356_v56 = vadd.f32 %v1352_v38, %v1310_v37  ;;  %v933_v52 = vpop.f32.mrf.mxu3 }
 0x312   :  { %v1013_v31 = vrot.slane %v1012_v9, 1  ;;  %v1065_v47 = vmax.f32 %v1061_v51, 0.0  ;;  %v1278_v53 = vpop.f32.mrf.mxu2 }
 0x313   :  { %v1322_v35 = vrot.slane %v1321_v41, 1  ;;  %v1360_v54 = vmax.f32 %v1356_v56, 0.0  ;;  %v984_v58 = vpop.f32.mrf.mxu0 }
 0x314   :  { %v1014_v39 = vmax.f32 %v1012_v9, %v1013_v31  ;;  %v1231_v59 = vpop.f32.mrf.mxu1  ;;  %v1041_v25 = vmax.f32 %v982_v42, %v984_v58 }
 0x315   :  { %v1323_v43 = vmax.f32 %v1321_v41, %v1322_v35 }
 0x316   :  { %v1060_v45 = vadd.f32 %v1056_v34, %v1014_v39 }
 0x317   :  { %v1357_v46 = vadd.f32 %v1353_v36, %v1323_v43 }
 0x318   :  { %v1064_v48 = vmax.f32 %v1060_v45, 0.0 }
 0x319   :  { %v1361_v50 = vmax.f32 %v1357_v46, 0.0  ;;  %v935_v62 = vpop.f32.mrf.mxu3 }
 0x31a   :  { %v1068_v49 = vpack.c.bf16 %v1065_v47, %v1064_v48  ;;  %v1280_v63 = vpop.f32.mrf.mxu2  ;;  %v1028_v27 = vmax.f32 %v933_v52, %v935_v62 }
 0x31b   :  { %v1364_v10 = vpack.c.bf16 %v1361_v50, %v1360_v54 }
 0x31c   :  { %v1072_v55 = vrot.slane %v1068_v49, 3 }
 0x31d   :  { %1522 = vmatmul.bf16.gmra.mxu3 %v2902_v13  ;;  %1571 = vmatmul.bf16.gmra.mxu0 %v2902_v13  ;;  %v1368_v61 = vrot.slane %v1364_v10, 3  ;;  %v987_v4 = vpop.f32.mrf.mxu0 }
 0x31e   :  { %v1077_v57 = vsel %vm1074_vm1, %v1068_v49, %v1072_v55  ;;  %1816 = vmatmul.bf16.gmra.mxu1 %v2902_v13  ;;  %1865 = vmatmul.bf16.gmra.mxu2 %v2902_v13  ;;  %v1234_v5 = vpop.f32.mrf.mxu1  ;;  %v1042_v19 = vmax.f32 %v1041_v25, %v987_v4 }
 0x31f   :  { %1081 = vst [vmem:[#allocation1] ss:$4 sm:$0xff] %v1077_v57  ;;  %v1372_v3 = vsel %vm1074_vm1, %v1364_v10, %v1368_v61 }
 0x323   :  { %v938_v6 = vpop.f32.mrf.mxu3 }
 0x324   :  { %v1283_v7 = vpop.f32.mrf.mxu2  ;;  %v1029_v41 = vmax.f32 %v1028_v27, %v938_v6 }
 0x325   :  { %v989_v13 = vpop.f32.mrf.mxu0 }
 0x326   :  { %v2975_v1 = vld [vmem:[#allocation1] sm:$0xff]  ;;  %v1236_v29 = vpop.f32.mrf.mxu1  ;;  %v1043_v23 = vmax.f32 %v1042_v19, %v989_v13 }
 0x327   :  { %1376 = vst [vmem:[#allocation1] ss:$4 sm:$0xff] %v1372_v3 }
 0x32b   :  { %v940_v8 = vpop.f32.mrf.mxu3 }
 0x32c   :  { %v1285_v11 = vpop.f32.mrf.mxu2  ;;  %v1030_v39 = vmax.f32 %v1029_v41, %v940_v8 }
 0x32d   :  { %1527 = vmatmul.bf16.gmra.mxu3 %v2910_v32  ;;  %1576 = vmatmul.bf16.gmra.mxu0 %v2910_v32 }
 0x32e   :  { %1821 = vmatmul.bf16.gmra.mxu1 %v2910_v32  ;;  %1870 = vmatmul.bf16.gmra.mxu2 %v2910_v32  ;;  %v1324_v32 = vmax.f32 %v1229_v44, %v1231_v59 }
 0x330   :  { %v1325_v20 = vmax.f32 %v1324_v32, %v1234_v5 }
 0x331   :  { %v992_v12 = vpop.f32.mrf.mxu0 }
 0x332   :  { %v1239_v0 = vpop.f32.mrf.mxu1  ;;  %v1326_v24 = vmax.f32 %v1325_v20, %v1236_v29  ;;  %v1044_v30 = vmax.f32 %v1043_v23, %v992_v12 }
 0x334   :  { %v1327_v9 = vmax.f32 %v1326_v24, %v1239_v0 }
 0x337   :  { %v943_v14 = vpop.f32.mrf.mxu3 }
 0x338   :  { %v1288_v26 = vpop.f32.mrf.mxu2  ;;  %v1031_v47 = vmax.f32 %v1030_v39, %v943_v14 }
 0x339   :  { %v994_v16 = vpop.f32.mrf.mxu0 }
 0x33a   :  { %v1241_v17 = vpop.f32.mrf.mxu1  ;;  %v1045_v31 = vmax.f32 %v1044_v30, %v994_v16 }
 0x33b   :  { %v1328_v51 = vmax.f32 %v1327_v9, %v1241_v17 }
 0x33d   :  { %1532 = vmatmul.bf16.gmra.mxu3 %v2918_v60  ;;  %1581 = vmatmul.bf16.gmra.mxu0 %v2918_v60 }
 0x33e   :  { %1826 = vmatmul.bf16.gmra.mxu1 %v2918_v60  ;;  %1875 = vmatmul.bf16.gmra.mxu2 %v2918_v60  ;;  %v1337_v60 = vmax.f32 %v1278_v53, %v1280_v63 }
 0x33f   :  { %v945_v18 = vpop.f32.mrf.mxu3 }
 0x340   :  { %v1290_v33 = vpop.f32.mrf.mxu2  ;;  %v1338_v35 = vmax.f32 %v1337_v60, %v1283_v7  ;;  %v1032_v52 = vmax.f32 %v1031_v47, %v945_v18 }
 0x342   :  { %v1339_v44 = vmax.f32 %v1338_v35, %v1285_v11 }
 0x344   :  { %v1340_v49 = vmax.f32 %v1339_v44, %v1288_v26 }
 0x346   :  { %v1341_v54 = vmax.f32 %v1340_v49, %v1290_v33 }
 0x34a   :  { %v997_v21 = vpop.f32.mrf.mxu0 }
 0x34b   :  { %v1244_v2 = vpop.f32.mrf.mxu1  ;;  %v1046_v42 = vmax.f32 %v1045_v31, %v997_v21 }
 0x34c   :  { %v1329_v45 = vmax.f32 %v1328_v51, %v1244_v2 }
 0x34d   :  { %1537 = vmatmul.bf16.gmra.mxu3 %v2926_v15  ;;  %1586 = vmatmul.bf16.gmra.mxu0 %v2926_v15 }
 0x34e   :  { %1831 = vmatmul.bf16.gmra.mxu1 %v2926_v15  ;;  %1880 = vmatmul.bf16.gmra.mxu2 %v2926_v15 }
 0x350   :  { %v948_v37 = vpop.f32.mrf.mxu3 }
 0x351   :  { %v1293_v43 = vpop.f32.mrf.mxu2  ;;  %v1033_v55 = vmax.f32 %v1032_v52, %v948_v37 }
 0x352   :  { %v999_v46 = vpop.f32.mrf.mxu0  ;;  %v1342_v10 = vmax.f32 %v1341_v54, %v1293_v43 }
 0x353   :  { %v1047_v56 = vmax.f32 %v1046_v42, %v999_v46  ;;  %v1246_v48 = vpop.f32.mrf.mxu1 }
 0x354   :  { %v1330_v50 = vmax.f32 %v1329_v45, %v1246_v48 }
 0x355   :  { %v1048_v53 = vrot.slane %v1047_v56, 4 }
 0x356   :  { %v1331_v15 = vrot.slane %v1330_v50, 4 }
 0x357   :  { %v1049_v57 = vmax.f32 %v1047_v56, %v1048_v53 }
 0x358   :  { %v1332_v58 = vmax.f32 %v1330_v50, %v1331_v15  ;;  %v950_v59 = vpop.f32.mrf.mxu3  ;;  %v1088_v15 = vunpack.c.l.b16 %v2975_v1 }
 0x359   :  { %v1050_v61 = vrot.slane %v1049_v57, 2  ;;  %v1034_v62 = vmax.f32 %v1033_v55, %v950_v59  ;;  %v1295_v63 = vpop.f32.mrf.mxu2  ;;  %v1089_v55 = vunpack.c.h.b16 %v2975_v1 }
 0x35a   :  { %v1333_v3 = vrot.slane %v1332_v58, 2  ;;  %v1343_v4 = vmax.f32 %v1342_v10, %v1295_v63  ;;  %v2990_v5 = vpop.f32.mrf.mxu0  ;;  %v1377_v63 = vld [vmem:[#allocation1] sm:$0xff] }
 0x35b   :  { %v1051_v6 = vmax.f32 %v1049_v57, %v1050_v61  ;;  %v1035_v7 = vrot.slane %v1034_v62, 4  ;;  %v2992_v13 = vpop.f32.mrf.mxu1  ;;  %v1383_v1 = vunpack.c.l.b16 %v1377_v63 }
 0x35c   :  { %v1344_v29 = vrot.slane %v1343_v4, 4  ;;  %v1334_v11 = vmax.f32 %v1332_v58, %v1333_v3 }
 0x35d   :  { %v1052_v8 = vrot.slane %v1051_v6, 1  ;;  %v1036_v12 = vmax.f32 %v1034_v62, %v1035_v7 }
 0x35e   :  { %v1345_v0 = vmax.f32 %v1343_v4, %v1344_v29  ;;  %v1335_v25 = vrot.slane %v1334_v11, 1 }
 0x35f   :  { %v1037_v14 = vrot.slane %v1036_v12, 2  ;;  %v1053_v17 = vmax.f32 %v1051_v6, %v1052_v8 }
 0x360   :  { %v1346_v26 = vrot.slane %v1345_v0, 2  ;;  %v2994_v16 = vpop.f32.mrf.mxu3  ;;  %v1336_v24 = vmax.f32 %v1334_v11, %v1335_v25 }
 0x361   :  { %v1038_v32 = vmax.f32 %v1036_v12, %v1037_v14  ;;  %v2996_v18 = vpop.f32.mrf.mxu2  ;;  %v1063_v2 = vadd.f32 %v1057_v28, %v1053_v17 }
 0x362   :  { %v1347_v19 = vmax.f32 %v1345_v0, %v1346_v26  ;;  %v2998_v33 = vpop.f32.mrf.mxu0  ;;  %v1358_v35 = vadd.f32 %v1352_v38, %v1336_v24  ;;  %v1384_v0 = vunpack.c.h.b16 %v1377_v63 }
 0x363   :  { %v1039_v20 = vrot.slane %v1038_v32, 1  ;;  %v3000_v21 = vpop.f32.mrf.mxu1  ;;  %v1067_v31 = vmax.f32 %v1063_v2, 0.0 }
 0x364   :  { %v1348_v23 = vrot.slane %v1347_v19, 1  ;;  %v1362_v44 = vmax.f32 %v1358_v35, 0.0  ;;  %v1886_v2 = vmax.f32 %v2992_v13, %v3000_v21 }
 0x365   :  { %v1040_v27 = vmax.f32 %v1038_v32, %v1039_v20  ;;  %v1605_v20 = vmax.f32 %v2990_v5, %v2998_v33 }
 0x366   :  { %v1349_v30 = vmax.f32 %v1347_v19, %v1348_v23 }
 0x367   :  { %v1062_v60 = vadd.f32 %v1056_v34, %v1040_v27 }
 0x368   :  { %v1359_v9 = vadd.f32 %v1353_v36, %v1349_v30  ;;  %v3008_v41 = vpop.f32.mrf.mxu3 }
 0x369   :  { %v1066_v51 = vmax.f32 %v1062_v60, 0.0  ;;  %v3012_v37 = vpop.f32.mrf.mxu2 }
 0x36a   :  { %v1557_v39 = vpop.f32.mrf.mxu0  ;;  %v1363_v42 = vmax.f32 %v1359_v9, 0.0  ;;  %v1899_v5 = vmax.f32 %v2996_v18, %v3012_v37 }
 0x36b   :  { %v1069_v28 = vpack.c.bf16 %v1067_v31, %v1066_v51  ;;  %v1802_v43 = vpop.f32.mrf.mxu1  ;;  %v1606_v27 = vmax.f32 %v1605_v20, %v1557_v39  ;;  %v3049_v20 = vld [vmem:[%s3101_s10 + $0x6] sm:$0x3] }
 0x36c   :  { %v1365_v34 = vpack.c.bf16 %v1363_v42, %v1362_v44  ;;  %v1887_v9 = vmax.f32 %v1886_v2, %v1802_v43  ;;  %v1592_v42 = vmax.f32 %v2994_v16, %v3008_v41 }
 0x36d   :  { %v1073_v45 = vrot.slane %v1069_v28, 3 }
 0x36e   :  { %v1369_v56 = vrot.slane %v1365_v34, 3 }
 0x36f   :  { %v1080_v22 = vsel %vm1074_vm1, %v1069_v28, %v1073_v45 }
 0x370   :  { %1085 = vst [vmem:[#allocation1 + $0x20] ss:$4 sm:$0xff] %v1080_v22  ;;  %v1508_v36 = vpop.f32.mrf.mxu3  ;;  %v1375_v38 = vsel %vm1074_vm1, %v1365_v34, %v1369_v56 }
 0x371   :  { %v1851_v46 = vpop.f32.mrf.mxu2  ;;  %v1593_v13 = vmax.f32 %v1592_v42, %v1508_v36 }
 0x372   :  { %v1559_v47 = vpop.f32.mrf.mxu0  ;;  %v1900_v39 = vmax.f32 %v1899_v5, %v1851_v46 }
 0x373   :  { %v1804_v48 = vpop.f32.mrf.mxu1  ;;  %v1607_v35 = vmax.f32 %v1606_v27, %v1559_v47 }
 0x374   :  { %v1888_v28 = vmax.f32 %v1887_v9, %v1804_v48  ;;  %v1941_v9 = vperm.slane %v3049_v20, 1 }
 0x377   :  { %v1086_v40 = vld [vmem:[#allocation1 + $0x20] sm:$0xff] }
 0x378   :  { %1380 = vst [vmem:[#allocation1 + $0x20] ss:$4 sm:$0xff] %v1375_v38  ;;  %v1510_v49 = vpop.f32.mrf.mxu3  ;;  %v1090_v50 = vunpack.c.l.b16 %v1086_v40  ;;  %v1091_v52 = vunpack.c.h.b16 %v1086_v40 }
 0x379   :  { %v1853_v53 = vpop.f32.mrf.mxu2  ;;  %v1594_v34 = vmax.f32 %v1593_v13, %v1510_v49 }
 0x37a   :  { %v1562_v54 = vpop.f32.mrf.mxu0  ;;  %v1092_v57 = vrot.slane %v1090_v50, 7  ;;  %v1095_v10 = vrot.slane %v1091_v52, 7  ;;  %v1901_v40 = vmax.f32 %v1900_v39, %v1853_v53 }
 0x37b   :  { %v1807_v58 = vpop.f32.mrf.mxu1  ;;  %v1608_v44 = vmax.f32 %v1607_v35, %v1562_v54 }
 0x37c   :  { %v1094_v59 = vsel %vm1093_vm2, %v1092_v57, %v1088_v15  ;;  %v1096_v61 = vsel %vm1093_vm2, %v1095_v10, %v1089_v55  ;;  %v1889_v33 = vmax.f32 %v1888_v28, %v1807_v58 }
 0x37d   :  { %v1097_v62 = vpack.c.b16 %v1096_v61, %v1094_v59 }
 0x37f   :  { %v1381_v3 = vld [vmem:[#allocation1 + $0x20] sm:$0xff]  ;;  %v1098_v4 = vrot.slane %v1097_v62, 3 }
 0x380   :  { %v1513_v6 = vpop.f32.mrf.mxu3  ;;  %v1385_v7 = vunpack.c.l.b16 %v1381_v3  ;;  %v1386_v29 = vunpack.c.h.b16 %v1381_v3 }
 0x381   :  { %v1856_v8 = vpop.f32.mrf.mxu2  ;;  %v1101_v11 = vsel %vm1074_vm1, %v1097_v62, %v1098_v4  ;;  %v1595_v48 = vmax.f32 %v1594_v34, %v1513_v6 }
 0x382   :  { %v1564_v12 = vpop.f32.mrf.mxu0  ;;  %1103 = vst [vmem:[#allocation5] sm:$0x3] %v1101_v11  ;;  %v1387_v14 = vrot.slane %v1385_v7, 7  ;;  %v1389_v26 = vrot.slane %v1386_v29, 7  ;;  %v1902_v16 = vmax.f32 %v1901_v40, %v1856_v8  ;;  %v3039_v11 = vld [vmem:[%s3101_s10 + $0x4] sm:$0x3] }
 0x383   :  { %v1809_v17 = vpop.f32.mrf.mxu1  ;;  %v1609_v21 = vmax.f32 %v1608_v44, %v1564_v12  ;;  %v1646_v27 = vperm.slane %v3039_v11, 0  ;;  %s2527_s10 = smov [#allocation5]  }
 0x384   :  { %v1388_v25 = vsel %vm1093_vm2, %v1387_v14, %v1383_v1  ;;  %v1390_v32 = vsel %vm1093_vm2, %v1389_v26, %v1384_v0  ;;  %v1890_v45 = vmax.f32 %v1889_v33, %v1809_v17  ;;  %v1647_v17 = vperm.slane %v3039_v11, 1  ;;  %s1991_s9 = sshll.u32 %s2527_s10, 4  ;;  %s1992_s9 = int_to_ptr.vmem [resolvable:$true] %s1991_s9 }
 0x385   :  { %v1391_v19 = vpack.c.b16 %v1390_v32, %v1388_v25 }
 0x387   :  { %v1392_v23 = vrot.slane %v1391_v19, 3 }
 0x388   :  { %v1515_v24 = vpop.f32.mrf.mxu3 }
 0x389   :  { %v1858_v30 = vpop.f32.mrf.mxu2  ;;  %v1395_v60 = vsel %vm1074_vm1, %v1391_v19, %v1392_v23  ;;  %v1596_v54 = vmax.f32 %v1595_v48, %v1515_v24 }
 0x38a   :  { %v1567_v31 = vpop.f32.mrf.mxu0  ;;  %1397 = vst [vmem:[#allocation5 + $0x2] sm:$0x3] %v1395_v60  ;;  %v1903_v18 = vmax.f32 %v1902_v16, %v1858_v30 }
 0x38b   :  { %v1812_v51 = vpop.f32.mrf.mxu1  ;;  %v1610_v43 = vmax.f32 %v1609_v21, %v1567_v31 }
 0x38c   :  { %v1891_v47 = vmax.f32 %v1890_v45, %v1812_v51  ;;  %v1940_v51 = vperm.slane %v3049_v20, 0 }
 0x390   :  { %v1518_v22 = vpop.f32.mrf.mxu3 }
 0x391   :  { %v1861_v56 = vpop.f32.mrf.mxu2  ;;  %v1597_v36 = vmax.f32 %v1596_v54, %v1518_v22 }
 0x392   :  { %v1569_v38 = vpop.f32.mrf.mxu0  ;;  %v1904_v46 = vmax.f32 %v1903_v18, %v1861_v56 }
 0x393   :  { %v1611_v50 = vmax.f32 %v1610_v43, %v1569_v38  ;;  %v1814_v52 = vpop.f32.mrf.mxu1 }
 0x394   :  { %v1892_v41 = vmax.f32 %v1891_v47, %v1814_v52 }
 0x395   :  { %v1612_v15 = vrot.slane %v1611_v50, 4 }
 0x396   :  { %v1893_v37 = vrot.slane %v1892_v41, 4 }
 0x397   :  { %v1613_v55 = vmax.f32 %v1611_v50, %v1612_v15 }
 0x398   :  { %v1894_v57 = vmax.f32 %v1892_v41, %v1893_v37  ;;  %v1520_v10 = vpop.f32.mrf.mxu3 }
 0x399   :  { %v1614_v49 = vrot.slane %v1613_v55, 2  ;;  %v1598_v58 = vmax.f32 %v1597_v36, %v1520_v10  ;;  %v1863_v59 = vpop.f32.mrf.mxu2 }
 0x39a   :  { %v1895_v53 = vrot.slane %v1894_v57, 2  ;;  %v1905_v61 = vmax.f32 %v1904_v46, %v1863_v59  ;;  %v3032_v62 = vpop.f32.mrf.mxu0 }
 0x39b   :  { %v1615_v63 = vmax.f32 %v1613_v55, %v1614_v49  ;;  %v1599_v3 = vrot.slane %v1598_v58, 4  ;;  %v3034_v4 = vpop.f32.mrf.mxu1 }
 0x39c   :  { %v1906_v6 = vrot.slane %v1905_v61, 4  ;;  %v1896_v29 = vmax.f32 %v1894_v57, %v1895_v53 }
 0x39d   :  { %v1616_v7 = vrot.slane %v1615_v63, 1  ;;  %v1600_v8 = vmax.f32 %v1598_v58, %v1599_v3 }
 0x39e   :  { %v1907_v12 = vmax.f32 %v1905_v61, %v1906_v6  ;;  %v1897_v25 = vrot.slane %v1896_v29, 1 }
 0x39f   :  { %v1601_v1 = vrot.slane %v1600_v8, 2  ;;  %v1617_v26 = vmax.f32 %v1615_v63, %v1616_v7 }
 0x3a0   :  { %v1908_v0 = vrot.slane %v1907_v12, 2  ;;  %v3041_v14 = vpop.f32.mrf.mxu3  ;;  %v1898_v35 = vmax.f32 %v1896_v29, %v1897_v25 }
 0x3a1   :  { %v1602_v32 = vmax.f32 %v1600_v8, %v1601_v1  ;;  %v3044_v19 = vpop.f32.mrf.mxu2  ;;  %v1651_v31 = vadd.f32 %v1647_v17, %v1617_v26 }
 0x3a2   :  { %v1909_v23 = vmax.f32 %v1907_v12, %v1908_v0  ;;  %v1574_v2 = vpop.f32.mrf.mxu0  ;;  %v1944_v21 = vadd.f32 %v1940_v51, %v1898_v35 }
 0x3a3   :  { %v1603_v24 = vrot.slane %v1602_v32, 1  ;;  %v1819_v30 = vpop.f32.mrf.mxu1  ;;  %v1655_v13 = vmax.f32 %v1651_v31, 0.0  ;;  %v1631_v59 = vmax.f32 %v3032_v62, %v1574_v2 }
 0x3a4   :  { %v1910_v60 = vrot.slane %v1909_v23, 1  ;;  %v1948_v40 = vmax.f32 %v1944_v21, 0.0  ;;  %v1912_v53 = vmax.f32 %v3034_v4, %v1819_v30 }
 0x3a5   :  { %v1604_v28 = vmax.f32 %v1602_v32, %v1603_v24 }
 0x3a6   :  { %v1911_v42 = vmax.f32 %v1909_v23, %v1910_v60 }
 0x3a7   :  { %v1650_v44 = vadd.f32 %v1646_v27, %v1604_v28 }
 0x3a8   :  { %v1945_v5 = vadd.f32 %v1941_v9, %v1911_v42  ;;  %v1525_v33 = vpop.f32.mrf.mxu3 }
 0x3a9   :  { %v1654_v39 = vmax.f32 %v1650_v44, 0.0  ;;  %v1868_v45 = vpop.f32.mrf.mxu2  ;;  %v1618_v1 = vmax.f32 %v3041_v14, %v1525_v33 }
 0x3aa   :  { %v1577_v22 = vpop.f32.mrf.mxu0  ;;  %v1949_v43 = vmax.f32 %v1945_v5, 0.0  ;;  %v1925_v26 = vmax.f32 %v3044_v19, %v1868_v45 }
 0x3ab   :  { %v1658_v34 = vpack.c.bf16 %v1655_v13, %v1654_v39  ;;  %v1822_v56 = vpop.f32.mrf.mxu1  ;;  %v1632_v63 = vmax.f32 %v1631_v59, %v1577_v22 }
 0x3ac   :  { %v1952_v48 = vpack.c.bf16 %v1949_v43, %v1948_v40  ;;  %v1913_v6 = vmax.f32 %v1912_v53, %v1822_v56 }
 0x3ad   :  { %v1662_v47 = vrot.slane %v1658_v34, 3 }
 0x3ae   :  { %v1956_v41 = vrot.slane %v1952_v48, 3 }
 0x3af   :  { %v1666_v38 = vsel %vm1074_vm1, %v1658_v34, %v1662_v47 }
 0x3b0   :  { %1670 = vst [vmem:[#allocation1] ss:$4 sm:$0xff] %v1666_v38  ;;  %v1528_v50 = vpop.f32.mrf.mxu3  ;;  %v1960_v18 = vsel %vm1074_vm1, %v1952_v48, %v1956_v41 }
 0x3b1   :  { %v1871_v52 = vpop.f32.mrf.mxu2  ;;  %v1619_v32 = vmax.f32 %v1618_v1, %v1528_v50 }
 0x3b2   :  { %v1579_v16 = vpop.f32.mrf.mxu0  ;;  %v1926_v24 = vmax.f32 %v1925_v26, %v1871_v52 }
 0x3b3   :  { %v1824_v54 = vpop.f32.mrf.mxu1  ;;  %v1633_v29 = vmax.f32 %v1632_v63, %v1579_v16 }
 0x3b4   :  { %v1914_v12 = vmax.f32 %v1913_v6, %v1824_v54 }
 0x3b7   :  { %v3063_v15 = vld [vmem:[#allocation1] sm:$0xff] }
 0x3b8   :  { %1964 = vst [vmem:[#allocation1] ss:$4 sm:$0xff] %v1960_v18  ;;  %v1530_v37 = vpop.f32.mrf.mxu3  ;;  %v1677_v20 = vunpack.c.l.b16 %v3063_v15 }
 0x3b9   :  { %v1873_v36 = vpop.f32.mrf.mxu2  ;;  %v1620_v4 = vmax.f32 %v1619_v32, %v1530_v37 }
 0x3ba   :  { %v1582_v55 = vpop.f32.mrf.mxu0  ;;  %v1927_v31 = vmax.f32 %v1926_v24, %v1873_v36 }
 0x3bb   :  { %v1827_v46 = vpop.f32.mrf.mxu1  ;;  %v1634_v0 = vmax.f32 %v1633_v29, %v1582_v55 }
 0x3bc   :  { %v1915_v25 = vmax.f32 %v1914_v12, %v1827_v46 }
 0x3c0   :  { %v1533_v57 = vpop.f32.mrf.mxu3 }
 0x3c1   :  { %v1876_v10 = vpop.f32.mrf.mxu2  ;;  %v1621_v42 = vmax.f32 %v1620_v4, %v1533_v57 }
 0x3c2   :  { %v1584_v49 = vpop.f32.mrf.mxu0  ;;  %v1928_v13 = vmax.f32 %v1927_v31, %v1876_v10 }
 0x3c3   :  { %v1829_v58 = vpop.f32.mrf.mxu1  ;;  %v1635_v23 = vmax.f32 %v1634_v0, %v1584_v49 }
 0x3c4   :  { %v1916_v62 = vmax.f32 %v1915_v25, %v1829_v58 }
 0x3c8   :  { %v1535_v61 = vpop.f32.mrf.mxu3 }
 0x3c9   :  { %v1878_v3 = vpop.f32.mrf.mxu2  ;;  %v1622_v33 = vmax.f32 %v1621_v42, %v1535_v61 }
 0x3ca   :  { %v1587_v7 = vpop.f32.mrf.mxu0  ;;  %v1929_v19 = vmax.f32 %v1928_v13, %v1878_v3 }
 0x3cb   :  { %v1832_v8 = vpop.f32.mrf.mxu1  ;;  %v1636_v30 = vmax.f32 %v1635_v23, %v1587_v7 }
 0x3cc   :  { %v1917_v35 = vmax.f32 %v1916_v62, %v1832_v8 }
 0x3d0   :  { %v1538_v2 = vpop.f32.mrf.mxu3 }
 0x3d1   :  { %v1881_v60 = vpop.f32.mrf.mxu2  ;;  %v1623_v45 = vmax.f32 %v1622_v33, %v1538_v2 }
 0x3d2   :  { %v1589_v28 = vpop.f32.mrf.mxu0  ;;  %v1930_v34 = vmax.f32 %v1929_v19, %v1881_v60 }
 0x3d3   :  { %v1637_v44 = vmax.f32 %v1636_v30, %v1589_v28  ;;  %v1834_v5 = vpop.f32.mrf.mxu1  ;;  %v1965_v28 = vld [vmem:[#allocation1] sm:$0xff] }
 0x3d4   :  { %v1918_v14 = vmax.f32 %v1917_v35, %v1834_v5  ;;  %v1972_v33 = vunpack.c.h.b16 %v1965_v28 }
 0x3d5   :  { %v1638_v21 = vrot.slane %v1637_v44, 4 }
 0x3d6   :  { %v1919_v39 = vrot.slane %v1918_v14, 4 }
 0x3d7   :  { %v1639_v22 = vmax.f32 %v1637_v44, %v1638_v21 }
 0x3d8   :  { %v1920_v43 = vmax.f32 %v1918_v14, %v1919_v39  ;;  %v1540_v56 = vpop.f32.mrf.mxu3  ;;  %v1971_v14 = vunpack.c.l.b16 %v1965_v28 }
 0x3d9   :  { %v1640_v40 = vrot.slane %v1639_v22, 2  ;;  %v1624_v47 = vmax.f32 %v1623_v45, %v1540_v56  ;;  %v1883_v38 = vpop.f32.mrf.mxu2 }
 0x3da   :  { %v1921_v48 = vrot.slane %v1920_v43, 2  ;;  %v1931_v50 = vmax.f32 %v1930_v34, %v1883_v38 }
 0x3db   :  { %v1641_v52 = vmax.f32 %v1639_v22, %v1640_v40  ;;  %v1625_v16 = vrot.slane %v1624_v47, 4 }
 0x3dc   :  { %v1922_v41 = vmax.f32 %v1920_v43, %v1921_v48  ;;  %v1932_v54 = vrot.slane %v1931_v50, 4 }
 0x3dd   :  { %v1642_v18 = vrot.slane %v1641_v52, 1  ;;  %v1626_v37 = vmax.f32 %v1624_v47, %v1625_v16 }
 0x3de   :  { %v1923_v36 = vrot.slane %v1922_v41, 1  ;;  %v1933_v55 = vmax.f32 %v1931_v50, %v1932_v54 }
 0x3df   :  { %v1627_v46 = vrot.slane %v1626_v37, 2  ;;  %v1643_v10 = vmax.f32 %v1641_v52, %v1642_v18 }
 0x3e0   :  { %v1934_v57 = vrot.slane %v1933_v55, 2  ;;  %v1924_v58 = vmax.f32 %v1922_v41, %v1923_v36 }
 0x3e1   :  { %v1628_v49 = vmax.f32 %v1626_v37, %v1627_v46  ;;  %v1653_v63 = vadd.f32 %v1647_v17, %v1643_v10 }
 0x3e2   :  { %v1935_v59 = vmax.f32 %v1933_v55, %v1934_v57  ;;  %v1946_v6 = vadd.f32 %v1940_v51, %v1924_v58 }
 0x3e3   :  { %v1629_v53 = vrot.slane %v1628_v49, 1  ;;  %v1657_v12 = vmax.f32 %v1653_v63, 0.0 }
 0x3e4   :  { %v1936_v61 = vrot.slane %v1935_v59, 1  ;;  %v1950_v0 = vmax.f32 %v1946_v6, 0.0 }
 0x3e5   :  { %v1630_v3 = vmax.f32 %v1628_v49, %v1629_v53 }
 0x3e6   :  { %v1937_v7 = vmax.f32 %v1935_v59, %v1936_v61 }
 0x3e7   :  { %v1652_v29 = vadd.f32 %v1646_v27, %v1630_v3 }
 0x3e8   :  { %v1947_v8 = vadd.f32 %v1941_v9, %v1937_v7  ;;  %v1678_v9 = vunpack.c.h.b16 %v3063_v15 }
 0x3e9   :  { %v1656_v1 = vmax.f32 %v1652_v29, 0.0 }
 0x3ea   :  { %v1951_v26 = vmax.f32 %v1947_v8, 0.0 }
 0x3eb   :  { %v1659_v25 = vpack.c.bf16 %v1657_v12, %v1656_v1 }
 0x3ec   :  { %v1953_v32 = vpack.c.bf16 %v1951_v26, %v1950_v0 }
 0x3ed   :  { %v1663_v23 = vrot.slane %v1659_v25, 3 }
 0x3ee   :  { %v1957_v24 = vrot.slane %v1953_v32, 3 }
 0x3ef   :  { %v1669_v17 = vsel %vm1074_vm1, %v1659_v25, %v1663_v23 }
 0x3f0   :  { %1674 = vst [vmem:[#allocation1 + $0x20] ss:$4 sm:$0xff] %v1669_v17  ;;  %v1963_v51 = vsel %vm1074_vm1, %v1953_v32, %v1957_v24 }
 0x3f7   :  { %v1675_v62 = vld [vmem:[#allocation1 + $0x20] sm:$0xff] }
 0x3f8   :  { %1968 = vst [vmem:[#allocation1 + $0x20] ss:$4 sm:$0xff] %v1963_v51  ;;  %v1679_v11 = vunpack.c.l.b16 %v1675_v62  ;;  %v1680_v27 = vunpack.c.h.b16 %v1675_v62 }
 0x3fa   :  { %v1681_v2 = vrot.slane %v1679_v11, 7  ;;  %v1683_v4 = vrot.slane %v1680_v27, 7 }
 0x3fc   :  { %v1682_v30 = vsel %vm1093_vm2, %v1681_v2, %v1677_v20  ;;  %v1684_v60 = vsel %vm1093_vm2, %v1683_v4, %v1678_v9 }
 0x3fd   :  { %v1685_v31 = vpack.c.b16 %v1684_v60, %v1682_v30 }
 0x3ff   :  { %v1686_v35 = vrot.slane %v1685_v31, 3  ;;  %v1969_v42 = vld [vmem:[#allocation1 + $0x20] sm:$0xff] }
 0x400   :  { %v1973_v44 = vunpack.c.l.b16 %v1969_v42  ;;  %v1974_v5 = vunpack.c.h.b16 %v1969_v42 }
 0x401   :  { %v1689_v13 = vsel %vm1074_vm1, %v1685_v31, %v1686_v35 }
 0x402   :  { %1691 = vst [vmem:[#allocation5 + $0x4] sm:$0x3] %v1689_v13  ;;  %v1975_v21 = vrot.slane %v1973_v44, 7  ;;  %v1977_v19 = vrot.slane %v1974_v5, 7 }
 0x404   :  { %v1976_v15 = vsel %vm1093_vm2, %v1975_v21, %v1971_v14  ;;  %v1978_v39 = vsel %vm1093_vm2, %v1977_v19, %v1972_v33 }
 0x405   :  { %v1979_v45 = vpack.c.b16 %v1978_v39, %v1976_v15 }
 0x407   :  { %v1980_v22 = vrot.slane %v1979_v45, 3 }
 0x409   :  { %v1983_v34 = vsel %vm1074_vm1, %v1979_v45, %v1980_v22 }
 0x40a   :  { %1985 = vst [vmem:[#allocation5 + $0x6] sm:$0x3] %v1983_v34 }
 0x40b   :  { %1996 = dma.vmem_to_hbm [thread:$0]  %s1992_s9, 128, %s1994_s27, [#allocation4]  }
 0x40c   :  { %2519 = dma.done.wait [#allocation4], 128  }
 0x40d   :  { %2520 = vsyncadd [#allocation4], 4294967168 }
 0x40e   :  { %2001 = vsyncpa [#allocation3], 1 }
 0x40f   :  { %2002 = vsyncpa [#allocation4], 1 }

</bundles_post_ra>
